<compile_context>
chip_gen: v7x
topology: tpu7x:2x2x1
jax: 0.10.0
libtpu: 0.0.40
codegen_flags: <defaults>
</compile_context>

<pallas_src>
import functools
from typing import NamedTuple

import jax
import jax.numpy as jnp
from jax.experimental import pallas as pl
from jax.experimental.pallas import tpu as pltpu


# ---------------------------------------------------------------------------
# Experiment configuration (stands in for the external `exp_configuration`)
# ---------------------------------------------------------------------------
exp_configuration = {
    0: dict(
        mixup_layer='conv_linear_no_last',
        mix_prob=1.0,                  # always mix -> deterministic behavior
        channelwise=True,
        mix_upper_bound_feature=0.75,
        mix_lower_bound_feature=0.25,
        shuffle_image_feature='SelfShuffle',
        blending_mode_feature='M',
        mixed_image_type_feature='B',  # 'B' = recorded feature, 'A' = current output
        divisor=1,
    )
}


class Cfg(NamedTuple):
    """Hashable static config so each record/attack forward jits once."""
    mixup_layer: str
    prob: float
    channelwise: bool
    upper: float
    lower: float
    shuffle: str
    blend: str
    mixed_type: str
    divisor: int
    input_size: int
    batchsize: int
    selected_region: tuple
    layer_num: int
    feat_dtype: str


def _pick_block(n, target=8):
    """Samples per grid step: as large as possible (amortize the ~0.35us/step pipeline
    overhead, raise the MXU M dim to B*H) while dividing N and keeping >= 2 grid steps so
    both v7x TensorCores get work (no-op on single-core v5e/v6e)."""
    b = min(n, target)
    while b > 1 and (n % b != 0 or n // b < 2):
        b -= 1
    return max(b, 1)


# ---------------------------------------------------------------------------
# Pallas kernels
# ---------------------------------------------------------------------------
def _conv_band_matmul(x_ref, w_ref, b_ref, *, relu_input):
    """Shared conv body.

    x_ref: (B, H, W*Cin) lane-dense block (no halo); w_ref: (KH, W*Cin, W*Cout)
    block-tridiagonal per-tap weights (the W boundary of the SAME conv is folded into zero
    weight blocks); b_ref: (1, W*Cout) f32 bias (already tiled over w).

    The KH taps are KH MXU matmuls sharing one (B*H, W*Cin) LHS; the H halo is handled by
    masked row shifts of the tap outputs (VPU work, hidden under the MXU).  Returns the
    pre-activation accumulator as (B, H, W*Cout) f32.
    """
    B, H, KIN = x_ref.shape
    KH = w_ref.shape[0]
    WC = w_ref.shape[2]

    x = x_ref[...]
    if relu_input:                       # previous layer's ReLU, fused into this prologue
        x = jnp.maximum(x, 0)
    x2 = x.reshape(B * H, KIN)           # M = B*H rows for the MXU

    taps = [jnp.dot(x2, w_ref[dy], preferred_element_type=jnp.float32) for dy in range(KH)]

    c = KH // 2
    acc = taps[c]
    hrow = jax.lax.broadcasted_iota(jnp.int32, (B * H, 1), 0) % H
    for dy in range(KH):
        s = dy - c                       # vertical shift of this tap's contribution
        if s == 0:
            continue
        if s > 0:
            shifted = jnp.concatenate(
                [taps[dy][s:], jnp.zeros((s, WC), jnp.float32)], axis=0)
            valid = hrow < (H - s)
        else:
            shifted = jnp.concatenate(
                [jnp.zeros((-s, WC), jnp.float32), taps[dy][:s]], axis=0)
            valid = hrow >= (-s)
        acc = acc + jnp.where(valid, shifted, 0.0)

    acc = acc + b_ref[...].astype(jnp.float32)
    return acc.reshape(B, H, WC)


def _conv_kernel(x_ref, w_ref, b_ref, o_ref, *, relu_input):
    # Clean conv (record pass / un-mixed layers).  Emits pre-ReLU only; the consumer
    # (next conv or the Linear) fuses the ReLU in its prologue -> one HBM write per layer.
    acc = _conv_band_matmul(x_ref, w_ref, b_ref, relu_input=relu_input)
    o_ref[...] = acc.astype(o_ref.dtype)


def _conv_mix_kernel(idx_ref, x_ref, w_ref, b_ref, a_ref, prev_hbm_ref, o_ref,
                     prev_buf, sem, *, relu_input, blend, block_b):
    # Fully fused attack path: conv + bias + feature-mixup blend, with the batch-shuffle
    # gather done by per-row DMA from HBM using the scalar-prefetched permutation.
    g = pl.program_id(0)
    for b in range(block_b):                              # start gathers first: they hide
        src = idx_ref[g * block_b + b]                    # under the conv matmuls below
        pltpu.make_async_copy(prev_hbm_ref.at[src], prev_buf.at[b], sem.at[b]).start()

    acc = _conv_band_matmul(x_ref, w_ref, b_ref, relu_input=relu_input)   # (B, H, WC) f32

    for b in range(block_b):
        pltpu.make_async_copy(prev_hbm_ref.at[0], prev_buf.at[b], sem.at[b]).wait()

    a = a_ref[...].astype(jnp.float32)                    # (B, 1, WC): per-(sample, chan)
    prev = prev_buf[...].astype(jnp.float32)              # (B, H, WC): shuffled recording
    if blend == 'M':
        acc = (1.0 - a) * acc + a * prev
    else:                                                 # 'A'
        acc = acc + a * prev
    o_ref[...] = acc.astype(o_ref.dtype)                  # pre-ReLU; consumer fuses ReLU


def _linear_kernel(x_ref, w_ref, b_ref, o_ref, *, relu_input):
    # y = relu(x) @ W_ko + b with W already (K, O): plain MXU dot, no in-kernel transpose.
    x = x_ref[...]
    if relu_input:
        x = jnp.maximum(x, 0)
    acc = jnp.dot(x, w_ref[...], preferred_element_type=jnp.float32)
    o_ref[...] = (acc + b_ref[...].astype(jnp.float32)).astype(o_ref.dtype)


# ---------------------------------------------------------------------------
# Kernel wrappers
# ---------------------------------------------------------------------------
def conv3x3(x3, wfull, bwide, *, relu_input, out_dtype):
    """SAME 3x3 conv + bias on lane-dense (N, H, W*Cin) activations.
    Returns the pre-ReLU (N, H, W*Cout); the consumer fuses the ReLU in its prologue."""
    N, H, KIN = x3.shape
    KH, _, WC = wfull.shape
    B = _pick_block(N)
    kern = functools.partial(_conv_kernel, relu_input=relu_input)
    return pl.pallas_call(
        kern,
        out_shape=jax.ShapeDtypeStruct((N, H, WC), out_dtype),
        grid=(N // B,),
        in_specs=[pl.BlockSpec((B, H, KIN), lambda n: (n, 0, 0)),
                  pl.BlockSpec((KH, KIN, WC), lambda n: (0, 0, 0)),
                  pl.BlockSpec((1, WC), lambda n: (0, 0))],
        out_specs=pl.BlockSpec((B, H, WC), lambda n: (n, 0, 0)),
        compiler_params=pltpu.CompilerParams(dimension_semantics=("parallel",)),
    )(x3, wfull, bwide)


def conv3x3_mix(x3, wfull, bwide, a3, prev_rec, shuf_idx, *, relu_input, blend, out_dtype):
    """Attack path: conv + bias + mixup blend with DMA-gathered shuffled recording, fused."""
    N, H, KIN = x3.shape
    KH, _, WC = wfull.shape
    B = _pick_block(N)
    kern = functools.partial(_conv_mix_kernel, relu_input=relu_input, blend=blend, block_b=B)
    grid_spec = pltpu.PrefetchScalarGridSpec(
        num_scalar_prefetch=1,                 # permutation -> SMEM, read per-row in kernel
        grid=(N // B,),
        in_specs=[pl.BlockSpec((B, H, KIN), lambda n, idx: (n, 0, 0)),
                  pl.BlockSpec((KH, KIN, WC), lambda n, idx: (0, 0, 0)),
                  pl.BlockSpec((1, WC), lambda n, idx: (0, 0)),
                  pl.BlockSpec((B, 1, WC), lambda n, idx: (n, 0, 0)),
                  pl.BlockSpec(memory_space=pl.ANY)],     # recorded features stay in HBM
        out_specs=pl.BlockSpec((B, H, WC), lambda n, idx: (n, 0, 0)),
        scratch_shapes=[pltpu.VMEM((B, H, WC), prev_rec.dtype),
                        pltpu.SemaphoreType.DMA((B,))],
    )
    return pl.pallas_call(
        kern,
        out_shape=jax.ShapeDtypeStruct((N, H, WC), out_dtype),
        grid_spec=grid_spec,
        compiler_params=pltpu.CompilerParams(dimension_semantics=("parallel",)),
    )(shuf_idx, x3, wfull, bwide, a3, prev_rec)


def linear_bias(x, w_ko, b, *, relu_input):
    """PyTorch Linear on an already-(H,W,C)-ordered flat input; weight pre-transposed to
    (K, O) at init so the kernel is a plain (M,K)@(K,O) dot with fused input-ReLU + bias."""
    M, K = x.shape
    O = w_ko.shape[1]
    b2 = b.reshape(1, O).astype(jnp.float32)
    kern = functools.partial(_linear_kernel, relu_input=relu_input)
    # Everything (fc weight ~80 KiB) fits one VMEM block at these sizes; at larger K/O add a
    # K grid axis with a f32 VMEM accumulator (init/finalize via pl.when) and tile O.
    return pl.pallas_call(
        kern,
        out_shape=jax.ShapeDtypeStruct((M, O), jnp.float32),
        grid=(1,),
        in_specs=[pl.BlockSpec((M, K), lambda i: (0, 0)),
                  pl.BlockSpec((K, O), lambda i: (0, 0)),
                  pl.BlockSpec((1, O), lambda i: (0, 0))],
        out_specs=pl.BlockSpec((M, O), lambda i: (0, 0)),
    )(x, w_ko, b2)


# ---------------------------------------------------------------------------
# One-time parameter preparation (no per-forward weight massaging)
# ---------------------------------------------------------------------------
def _prep_conv_weights(w_oihw, b, W, dtype):
    """Fold a SAME KxK conv into KH block-tridiagonal matmul weights over the lane-dense
    (w*Cin) -> (w*Cout) axes, so the kernel needs no W-direction halo at all:

        wfull[dy][w_src*Cin + ci, w_dst*Cout + o] = w[o, ci, dy, dx]  with w_src = w_dst + dx - 1
        (out-of-range w_src -> zero block == SAME zero padding in W)

    NOTE (v7x): wfull is KH*(W*Cin)*(W*Cout) elements, growing ~W^2*Cin*Cout.  If the model
    scales beyond these toy dims, tile the output-lane axis over a second grid dim (column
    slices of wfull) or raise vmem_limit_bytes; v7x's scoped-VMEM default is 32 MiB.
    """
    Cout, Cin, KH, KW = w_oihw.shape
    wt = jnp.transpose(w_oihw, (2, 3, 1, 0))                     # (KH, KW, Cin, Cout)
    # bands[dx][w_src, w_dst] = 1 iff w_src == w_dst + dx - 1
    bands = jnp.stack([jnp.eye(W, W, k=1 - dx, dtype=wt.dtype) for dx in range(KW)])
    wfull = jnp.einsum('xuv,kxio->kuivo', bands, wt)             # (KH, W, Cin, W, Cout)
    wfull = wfull.reshape(KH, W * Cin, W * Cout).astype(dtype)
    bwide = jnp.tile(b.astype(jnp.float32), W).reshape(1, W * Cout)
    return wfull, bwide


def _prep_fc_weight(fc_w, C, H, W, dtype):
    """Permute the Linear K axis from PyTorch's (C,H,W) flatten order to the pipeline's
    (H,W,C) order and pre-transpose to (K, O), so the forward needs no activation transpose
    and the kernel needs no in-kernel weight transpose."""
    O = fc_w.shape[0]
    w = jnp.transpose(fc_w.reshape(O, C, H, W), (0, 2, 3, 1)).reshape(O, H * W * C)
    return jnp.transpose(w).astype(dtype)                        # (K, O)


# ---------------------------------------------------------------------------
# FeatureMixupEverywhere hook logic (traced; record & attack forwards are jitted)
# ---------------------------------------------------------------------------
def _shuffle_indices(kp, cfg, n_out, n_src):
    """Per-output-sample source rows for the batch shuffle.  The gather itself is done inside
    the Pallas kernel (scalar-prefetched indices + per-row HBM DMA), not via jnp.take."""
    if cfg.shuffle == 'SelfShuffle':
        idx0 = jax.random.permutation(kp, cfg.batchsize)
        idx = idx0
        for r in cfg.selected_region:
            idx = jnp.concatenate([idx, idx0 + (r + 1) * cfg.batchsize])
    else:                                                        # 'None': keep order
        idx = jnp.arange(n_out)
    if idx.shape[0] < n_out:
        # TODO(synk): batches larger than (len(selected_region)+1)*batchsize keep own rows.
        idx = jnp.concatenate([idx, jnp.arange(idx.shape[0], n_out)])
    idx = idx[:n_out]
    return jnp.clip(idx, 0, n_src - 1).astype(jnp.int32)        # guard the HBM row DMA


def _mix_coeff(ka, gate, nsamp, channels, repeat, cfg):
    """Per-(sample, channel) U[lower, upper) coefficient as a lane vector (repeats every
    `channels` lanes), gated by the traced Bernoulli mix decision (gate==0 -> identity)."""
    ratio = cfg.upper - cfg.lower
    if cfg.channelwise:
        a = jax.random.uniform(ka, (nsamp, channels)) * ratio + cfg.lower
        a = a * gate
        if repeat > 1:
            a = jnp.tile(a, (1, repeat))
    else:
        a = jax.random.uniform(ka, (nsamp,)) * ratio + cfg.lower
        a = jnp.broadcast_to((a * gate)[:, None], (nsamp, channels * repeat))
    return a.reshape(nsamp, 1, channels * repeat)


def _hooked_conv(x3, wfull, bwide, w_spatial, layer_idx, cfg, rec, new_rec, key, record,
                 relu_input, feat_dtype):
    """Conv2d leaf + its forward hook (record / mix), fused into one kernel.  Returns the
    layer's pre-ReLU output (hook semantics act on the module output); the consumer fuses
    the ReLU in its prologue."""
    N = x3.shape[0]
    cout = wfull.shape[2] // w_spatial
    eligible = w_spatial <= cfg.input_size // cfg.divisor   # NCHW output.size()[-1] == W

    if record:
        raw = conv3x3(x3, wfull, bwide, relu_input=relu_input, out_dtype=feat_dtype)
        if eligible:
            new_rec[layer_idx] = raw                        # clone/detach: JAX arrays immutable
        return raw
    if (not eligible) or (layer_idx not in rec):
        return conv3x3(x3, wfull, bwide, relu_input=relu_input, out_dtype=feat_dtype)

    kc, kp, ka = jax.random.split(key, 3)
    # Traced Bernoulli gate (replaces torch.rand(1).item(): no host sync, fully jittable).
    gate = (jax.random.uniform(kc, ()) <= cfg.prob).astype(jnp.float32)
    a3 = _mix_coeff(ka, gate, N, cout, w_spatial, cfg)

    # TODO(synk): mixup_layer == 'relu'/'bn' hooks BatchNorm2d leaves; this synthetic CNN
    # only exercises the 'conv_linear_*' modes.
    if cfg.mixed_type == 'A':
        # Blend with the layer's own (shuffled) output -> needs the clean output first.
        # TODO(synk): non-default path; gather + blend left to XLA here.
        raw = conv3x3(x3, wfull, bwide, relu_input=relu_input, out_dtype=feat_dtype)
        idx = _shuffle_indices(kp, cfg, N, N)
        prev_shuf = jnp.take(raw, idx, axis=0).astype(jnp.float32)
        r32 = raw.astype(jnp.float32)
        out = (1.0 - a3) * r32 + a3 * prev_shuf if cfg.blend == 'M' else r32 + a3 * prev_shuf
        return out.astype(feat_dtype)

    prev_rec = rec[layer_idx]
    idx = _shuffle_indices(kp, cfg, N, prev_rec.shape[0])
    return conv3x3_mix(x3, wfull, bwide, a3, prev_rec, idx,
                       relu_input=relu_input, blend=cfg.blend, out_dtype=feat_dtype)


def _forward_impl(dp, x_nchw, cfg, rec, key, record):
    new_rec = {}
    feat_dtype = jnp.dtype(cfg.feat_dtype)
    if record or key is None:
        k0 = k1 = k2 = None
    else:
        k0, k1, k2 = jax.random.split(key, 3)

    N, Cin, H, W = x_nchw.shape
    # NCHW -> lane-dense (N, H, W*Cin): the contiguous reshape of NHWC (channels minor).
    x3 = jnp.transpose(x_nchw, (0, 2, 3, 1)).reshape(N, H, W * Cin).astype(feat_dtype)

    # layer 0: Conv2d 3x3 (hooked); emits pre-ReLU, the next layer fuses the ReLU.
    h = _hooked_conv(x3, dp['conv1_wfull'], dp['conv1_bwide'], W, 0, cfg, rec, new_rec,
                     k0, record, relu_input=False, feat_dtype=feat_dtype)
    # layer 1: Conv2d 3x3 (hooked), consuming ReLU(layer 0) via its prologue.
    h = _hooked_conv(h, dp['conv2_wfull'], dp['conv2_bwide'], W, 1, cfg, rec, new_rec,
                     k1, record, relu_input=True, feat_dtype=feat_dtype)

    # layer 2: Linear (hooked).  Activations are already (H, W, C)-ordered and the fc weight's
    # K axis was pre-permuted at init, so flattening is a free reshape (no transpose pass).
    flat = h.reshape(N, -1)
    logits = linear_bias(flat, dp['fc_w_ko'], dp['fc_b'], relu_input=True)

    if cfg.mixup_layer == 'conv_linear_no_last' and 2 + 1 == cfg.layer_num:
        pass                                                # last Linear: never recorded/mixed
    elif record:
        new_rec[2] = logits
    elif 2 in rec:                                          # 'conv_linear_include_last' attack
        kc, kp, ka = jax.random.split(k2, 3)
        gate = (jax.random.uniform(kc, ()) <= cfg.prob).astype(jnp.float32)
        prev = logits if cfg.mixed_type == 'A' else rec[2]
        idx = _shuffle_indices(kp, cfg, N, prev.shape[0])
        # TODO(synk): non-default path kept as plain XLA gather+blend (tiny (N, classes) slab).
        prev_shuf = jnp.take(prev, idx, axis=0).astype(jnp.float32)
        O = logits.shape[1]
        a = _mix_coeff(ka, gate, N, O, 1, cfg).reshape(N, O)
        logits = (1.0 - a) * logits + a * prev_shuf if cfg.blend == 'M' else logits + a * prev_shuf
    return logits, new_rec


@functools.partial(jax.jit, static_argnames=('cfg',))
def _record_forward(dev_params, x_nchw, cfg):
    return _forward_impl(dev_params, x_nchw, cfg, rec={}, key=None, record=True)


@functools.partial(jax.jit, static_argnames=('cfg',))
def _attack_forward(dev_params, x_nchw, rec, key, cfg):
    logits, _ = _forward_impl(dev_params, x_nchw, cfg, rec=rec, key=key, record=False)
    return logits


# ---------------------------------------------------------------------------
# FeatureMixupEverywhere (JAX/Pallas version) wrapping a small synthetic CNN:
# Conv3x3 -> ReLU -> Conv3x3 -> ReLU -> Linear.  Hooked leaves: conv1, conv2, fc.
# ---------------------------------------------------------------------------
class FeatureMixupEverywhereJAX:
    def __init__(self, params, config_idx, input_size, feature_dtype='float32'):
        self.cfg_dict = exp_configuration[config_idx]
        self.input_size = int(input_size)
        self.feature_dtype = feature_dtype      # 'bfloat16' halves HBM traffic on v6e/v7x
        self.record = False
        self.outputs = {}
        self.batchsize = 1
        self.masknum = 0
        self.selected_region = []
        self.layer_num = 3                      # Conv2d, Conv2d, Linear leaves
        self.dev_params = self._prepare_params(params)

    def _prepare_params(self, p):
        dt = jnp.dtype(self.feature_dtype)
        W = self.input_size
        c1w, c1b = _prep_conv_weights(p['conv1_w'], p['conv1_b'], W, dt)
        c2w, c2b = _prep_conv_weights(p['conv2_w'], p['conv2_b'], W, dt)
        C2 = p['conv2_w'].shape[0]
        fc_w_ko = _prep_fc_weight(p['fc_w'], C2, W, W, dt)
        return dict(conv1_wfull=c1w, conv1_bwide=c1b,
                    conv2_wfull=c2w, conv2_bwide=c2b,
                    fc_w_ko=fc_w_ko, fc_b=p['fc_b'].astype(jnp.float32))

    def _static_cfg(self):
        d = self.cfg_dict
        return Cfg(mixup_layer=d['mixup_layer'], prob=float(d['mix_prob']),
                   channelwise=bool(d['channelwise']),
                   upper=float(d['mix_upper_bound_feature']),
                   lower=float(d['mix_lower_bound_feature']),
                   shuffle=d['shuffle_image_feature'],
                   blend=d['blending_mode_feature'],
                   mixed_type=d['mixed_image_type_feature'],
                   divisor=int(d['divisor']), input_size=int(self.input_size),
                   batchsize=int(self.batchsize),
                   selected_region=tuple(int(r) for r in self.selected_region),
                   layer_num=int(self.layer_num),
                   feat_dtype=str(self.feature_dtype))

    def start_feature_record(self):
        self.record = True

    def end_feature_record(self):
        self.record = False

    def set_paras(self, batchsize, masknum, selected_region):
        self.batchsize = batchsize
        self.masknum = masknum
        self.selected_region = selected_region

    def forward(self, x_nchw, key):
        cfg = self._static_cfg()
        if self.record:
            logits, rec = _record_forward(self.dev_params, x_nchw, cfg=cfg)
            self.outputs = dict(rec)
            return logits
        return _attack_forward(self.dev_params, x_nchw, self.outputs, key, cfg=cfg)


# ---------------------------------------------------------------------------
# Pure-JAX reference for the clean (record-pass) forward — structural self-check.
# ---------------------------------------------------------------------------
def _reference_logits(params, x_nchw):
    hi = jax.lax.Precision.HIGHEST
    x = jnp.transpose(x_nchw, (0, 2, 3, 1))

    def conv(v, w, b):
        y = jax.lax.conv_general_dilated(
            v, jnp.transpose(w, (2, 3, 1, 0)), (1, 1), 'SAME',
            dimension_numbers=('NHWC', 'HWIO', 'NHWC'), precision=hi)
        return y + b

    h = jax.nn.relu(conv(x, params['conv1_w'], params['conv1_b']))
    h = jax.nn.relu(conv(h, params['conv2_w'], params['conv2_b']))
    flat = jnp.transpose(h, (0, 3, 1, 2)).reshape(x.shape[0], -1)   # PyTorch (C,H,W) flatten
    return jnp.dot(flat, params['fc_w'].T, precision=hi) + params['fc_b']


# ---------------------------------------------------------------------------
if __name__ == "__main__":
    key = jax.random.PRNGKey(0)
    (kx, kw1, kb1, kw2, kb2, kw3, kb3, kfwd_rec, kfwd_mix) = jax.random.split(key, 9)

    N, Cin, H, W = 2, 4, 16, 16
    C1, C2, num_classes = 8, 8, 10

    x = jax.random.normal(kx, (N, Cin, H, W), jnp.float32)

    # Deterministic synthetic parameters (PyTorch weight layouts).
    params = dict(
        conv1_w=0.10 * jax.random.normal(kw1, (C1, Cin, 3, 3), jnp.float32),
        conv1_b=0.10 * jax.random.normal(kb1, (C1,), jnp.float32),
        conv2_w=0.10 * jax.random.normal(kw2, (C2, C1, 3, 3), jnp.float32),
        conv2_b=0.10 * jax.random.normal(kb2, (C2,), jnp.float32),
        fc_w=0.05 * jax.random.normal(kw3, (num_classes, C2 * H * W), jnp.float32),
        fc_b=0.05 * jax.random.normal(kb3, (num_classes,), jnp.float32),
    )

    mdl = FeatureMixupEverywhereJAX(params, config_idx=0, input_size=W)
    mdl.set_paras(batchsize=N, masknum=0, selected_region=[])

    # Pass 1: record clean per-layer features (hooks store, don't mix).
    mdl.start_feature_record()
    clean_logits = jax.block_until_ready(mdl.forward(x, kfwd_rec))
    mdl.end_feature_record()

    # Structural correctness: the record pass is the clean forward -> compare to pure JAX.
    ref = _reference_logits(params, x)
    assert clean_logits.shape == (N, num_classes)
    assert bool(jnp.allclose(clean_logits, ref, rtol=1e-2, atol=1e-2))

    # Pass 2: attack pass — hooks blend (shuffled) stored features into layer outputs.
    out = jax.block_until_ready(mdl.forward(x, kfwd_mix))
    assert out.shape == (N, num_classes)
    assert bool(jnp.all(jnp.isfinite(out)))
    print("KERNEL_OK")
</pallas_src>

<mosaic_0001>
module attributes {stable_mosaic.version = 11 : i64} {
  func.func @_conv_kernel(%arg0: i32, %arg1: memref<1x16x64xf32, #tpu.memory_space<vmem>>, %arg2: memref<3x64x128xf32, #tpu.memory_space<vmem>>, %arg3: memref<1x128xf32, #tpu.memory_space<vmem>>, %arg4: memref<1x16x128xf32, #tpu.memory_space<vmem>>) attributes {dimension_semantics = [#tpu.dimension_semantics<parallel>], iteration_bounds = array<i64: 2>, scalar_prefetch = 0 : i64, scratch_operands = 0 : i64, tpu.core_type = #tpu.core_type<tc>, window_params = [{transform_indices = @transform_0, window_bounds = array<i64: 1, 16, 64>}, {pipeline_mode = #tpu.pipeline_mode<synchronous>, transform_indices = @transform_1, window_bounds = array<i64: 3, 64, 128>}, {pipeline_mode = #tpu.pipeline_mode<synchronous>, transform_indices = @transform_2, window_bounds = array<i64: 1, 128>}, {transform_indices = @transform_3, window_bounds = array<i64: 1, 16, 128>}]} {
    %c0 = arith.constant 0 : index
    %c0_0 = arith.constant 0 : index
    %c0_1 = arith.constant 0 : index
    %0 = vector.load %arg1[%c0, %c0_0, %c0_1] : memref<1x16x64xf32, #tpu.memory_space<vmem>>, vector<1x16x64xf32>
    %1 = vector.shape_cast %0 : vector<1x16x64xf32> to vector<16x64xf32>
    %c0_2 = arith.constant 0 : index
    %c0_3 = arith.constant 0 : index
    %c0_4 = arith.constant 0 : index
    %2 = vector.load %arg2[%c0_2, %c0_3, %c0_4] : memref<3x64x128xf32, #tpu.memory_space<vmem>>, vector<1x64x128xf32>
    %3 = vector.shape_cast %2 : vector<1x64x128xf32> to vector<64x128xf32>
    %cst = arith.constant dense<0.000000e+00> : vector<16x128xf32>
    %4 = tpu.matmul %1, %3, %cst {dimension_numbers = #tpu.dot_dimension_numbers<[1], [0], [0], [1], [0, 0, 1, 1], [], []>} : vector<16x64xf32>, vector<64x128xf32>, vector<16x128xf32> -> vector<16x128xf32>
    %c1 = arith.constant 1 : index
    %c0_5 = arith.constant 0 : index
    %c0_6 = arith.constant 0 : index
    %5 = vector.load %arg2[%c1, %c0_5, %c0_6] : memref<3x64x128xf32, #tpu.memory_space<vmem>>, vector<1x64x128xf32>
    %6 = vector.shape_cast %5 : vector<1x64x128xf32> to vector<64x128xf32>
    %cst_7 = arith.constant dense<0.000000e+00> : vector<16x128xf32>
    %7 = tpu.matmul %1, %6, %cst_7 {dimension_numbers = #tpu.dot_dimension_numbers<[1], [0], [0], [1], [0, 0, 1, 1], [], []>} : vector<16x64xf32>, vector<64x128xf32>, vector<16x128xf32> -> vector<16x128xf32>
    %c2 = arith.constant 2 : index
    %c0_8 = arith.constant 0 : index
    %c0_9 = arith.constant 0 : index
    %8 = vector.load %arg2[%c2, %c0_8, %c0_9] : memref<3x64x128xf32, #tpu.memory_space<vmem>>, vector<1x64x128xf32>
    %9 = vector.shape_cast %8 : vector<1x64x128xf32> to vector<64x128xf32>
    %cst_10 = arith.constant dense<0.000000e+00> : vector<16x128xf32>
    %10 = tpu.matmul %1, %9, %cst_10 {dimension_numbers = #tpu.dot_dimension_numbers<[1], [0], [0], [1], [0, 0, 1, 1], [], []>} : vector<16x64xf32>, vector<64x128xf32>, vector<16x128xf32> -> vector<16x128xf32>
    %11 = tpu.iota {dimensions = array<i32: 0>} : vector<16x1xi32>
    %c16_i32 = arith.constant 16 : i32
    %c0_i32 = arith.constant 0 : i32
    %12 = arith.cmpi eq, %c16_i32, %c0_i32 : i32
    %c1_i32 = arith.constant 1 : i32
    %13 = arith.select %12, %c1_i32, %c16_i32 : i32
    %14 = vector.broadcast %13 : i32 to vector<16x1xi32>
    %15 = arith.remsi %11, %14 : vector<16x1xi32>
    %c0_i32_11 = arith.constant 0 : i32
    %16 = vector.broadcast %c0_i32_11 : i32 to vector<16x1xi32>
    %17 = arith.cmpi ne, %15, %16 : vector<16x1xi32>
    %c0_i32_12 = arith.constant 0 : i32
    %18 = vector.broadcast %c0_i32_12 : i32 to vector<16x1xi32>
    %19 = arith.cmpi slt, %15, %18 : vector<16x1xi32>
    %c0_i32_13 = arith.constant 0 : i32
    %20 = arith.cmpi slt, %13, %c0_i32_13 : i32
    %21 = vector.broadcast %20 : i1 to vector<16x1xi1>
    %22 = vector.broadcast %21 : vector<16x1xi1> to vector<16x1xi1>
    %23 = arith.xori %19, %22 : vector<16x1xi1>
    %24 = arith.andi %23, %17 : vector<16x1xi1>
    %25 = vector.broadcast %13 : i32 to vector<16x1xi32>
    %26 = arith.addi %15, %25 : vector<16x1xi32>
    %27 = arith.select %24, %26, %15 : vector<16x1xi1>, vector<16x1xi32>
    %cst_14 = arith.constant 0.000000e+00 : f32
    %28 = vector.broadcast %cst_14 : f32 to vector<1x128xf32>
    %29 = vector.extract_strided_slice %4 {offsets = [0, 0], sizes = [15, 128], strides = [1, 1]} : vector<16x128xf32> to vector<15x128xf32>
    %30 = tpu.concatenate %28, %29 in 0 : vector<1x128xf32>, vector<15x128xf32> -> vector<16x128xf32>
    %c1_i32_15 = arith.constant 1 : i32
    %31 = vector.broadcast %c1_i32_15 : i32 to vector<16x1xi32>
    %32 = arith.cmpi sge, %27, %31 : vector<16x1xi32>
    %cst_16 = arith.constant 0.000000e+00 : f32
    %33 = vector.shape_cast %32 : vector<16x1xi1> to vector<16x1xi1>
    %34 = vector.broadcast %33 : vector<16x1xi1> to vector<16x128xi1>
    %35 = vector.broadcast %cst_16 : f32 to vector<16x128xf32>
    %36 = arith.select %34, %30, %35 : vector<16x128xi1>, vector<16x128xf32>
    %37 = arith.addf %7, %36 : vector<16x128xf32>
    %38 = vector.extract_strided_slice %10 {offsets = [1, 0], sizes = [15, 128], strides = [1, 1]} : vector<16x128xf32> to vector<15x128xf32>
    %cst_17 = arith.constant 0.000000e+00 : f32
    %39 = vector.broadcast %cst_17 : f32 to vector<1x128xf32>
    %40 = tpu.concatenate %38, %39 in 0 : vector<15x128xf32>, vector<1x128xf32> -> vector<16x128xf32>
    %c15_i32 = arith.constant 15 : i32
    %41 = vector.broadcast %c15_i32 : i32 to vector<16x1xi32>
    %42 = arith.cmpi slt, %27, %41 : vector<16x1xi32>
    %cst_18 = arith.constant 0.000000e+00 : f32
    %43 = vector.shape_cast %42 : vector<16x1xi1> to vector<16x1xi1>
    %44 = vector.broadcast %43 : vector<16x1xi1> to vector<16x128xi1>
    %45 = vector.broadcast %cst_18 : f32 to vector<16x128xf32>
    %46 = arith.select %44, %40, %45 : vector<16x128xi1>, vector<16x128xf32>
    %47 = arith.addf %37, %46 : vector<16x128xf32>
    %c0_19 = arith.constant 0 : index
    %c0_20 = arith.constant 0 : index
    %48 = vector.load %arg3[%c0_19, %c0_20] : memref<1x128xf32, #tpu.memory_space<vmem>>, vector<1x128xf32>
    %49 = vector.broadcast %48 : vector<1x128xf32> to vector<16x128xf32>
    %50 = arith.addf %47, %49 : vector<16x128xf32>
    %51 = vector.shape_cast %50 : vector<16x128xf32> to vector<1x16x128xf32>
    %c0_21 = arith.constant 0 : index
    %c0_22 = arith.constant 0 : index
    %c0_23 = arith.constant 0 : index
    %52 = vector.load %arg4[%c0_21, %c0_22, %c0_23] : memref<1x16x128xf32, #tpu.memory_space<vmem>>, vector<1x16x128xf32>
    tpu.vector_store %arg4[%c0_21, %c0_22, %c0_23], %51 {strides = array<i32>} : memref<1x16x128xf32, #tpu.memory_space<vmem>>, vector<1x16x128xf32>,
    return
  }
  func.func @transform_0(%arg0: i32) -> (i32, i32, i32) {
    %c0_i32 = arith.constant 0 : i32
    %c0_i32_0 = arith.constant 0 : i32
    %c0_i32_1 = arith.constant 0 : i32
    return %arg0, %c0_i32, %c0_i32_0 : i32, i32, i32
  }
  func.func @transform_1(%arg0: i32) -> (i32, i32, i32) {
    %c0_i32 = arith.constant 0 : i32
    %c0_i32_0 = arith.constant 0 : i32
    %c0_i32_1 = arith.constant 0 : i32
    %c0_i32_2 = arith.constant 0 : i32
    return %c0_i32, %c0_i32_0, %c0_i32_1 : i32, i32, i32
  }
  func.func @transform_2(%arg0: i32) -> (i32, i32) {
    %c0_i32 = arith.constant 0 : i32
    %c0_i32_0 = arith.constant 0 : i32
    %c0_i32_1 = arith.constant 0 : i32
    return %c0_i32, %c0_i32_0 : i32, i32
  }
  func.func @transform_3(%arg0: i32) -> (i32, i32, i32) {
    %c0_i32 = arith.constant 0 : i32
    %c0_i32_0 = arith.constant 0 : i32
    %c0_i32_1 = arith.constant 0 : i32
    return %arg0, %c0_i32, %c0_i32_0 : i32, i32, i32
  }
}

module attributes {stable_mosaic.version = 11 : i64} {
  func.func @_conv_kernel(%arg0: i32, %arg1: memref<1x16x128xf32, #tpu.memory_space<vmem>>, %arg2: memref<3x128x128xf32, #tpu.memory_space<vmem>>, %arg3: memref<1x128xf32, #tpu.memory_space<vmem>>, %arg4: memref<1x16x128xf32, #tpu.memory_space<vmem>>) attributes {dimension_semantics = [#tpu.dimension_semantics<parallel>], iteration_bounds = array<i64: 2>, scalar_prefetch = 0 : i64, scratch_operands = 0 : i64, tpu.core_type = #tpu.core_type<tc>, window_params = [{transform_indices = @transform_0, window_bounds = array<i64: 1, 16, 128>}, {pipeline_mode = #tpu.pipeline_mode<synchronous>, transform_indices = @transform_1, window_bounds = array<i64: 3, 128, 128>}, {pipeline_mode = #tpu.pipeline_mode<synchronous>, transform_indices = @transform_2, window_bounds = array<i64: 1, 128>}, {transform_indices = @transform_3, window_bounds = array<i64: 1, 16, 128>}]} {
    %c0 = arith.constant 0 : index
    %c0_0 = arith.constant 0 : index
    %c0_1 = arith.constant 0 : index
    %0 = vector.load %arg1[%c0, %c0_0, %c0_1] : memref<1x16x128xf32, #tpu.memory_space<vmem>>, vector<1x16x128xf32>
    %cst = arith.constant 0.000000e+00 : f32
    %1 = vector.broadcast %cst : f32 to vector<1x16x128xf32>
    %2 = arith.maximumf %0, %1 : vector<1x16x128xf32>
    %3 = vector.shape_cast %2 : vector<1x16x128xf32> to vector<16x128xf32>
    %c0_2 = arith.constant 0 : index
    %c0_3 = arith.constant 0 : index
    %c0_4 = arith.constant 0 : index
    %4 = vector.load %arg2[%c0_2, %c0_3, %c0_4] : memref<3x128x128xf32, #tpu.memory_space<vmem>>, vector<1x128x128xf32>
    %5 = vector.shape_cast %4 : vector<1x128x128xf32> to vector<128x128xf32>
    %cst_5 = arith.constant dense<0.000000e+00> : vector<16x128xf32>
    %6 = tpu.matmul %3, %5, %cst_5 {dimension_numbers = #tpu.dot_dimension_numbers<[1], [0], [0], [1], [0, 0, 1, 1], [], []>} : vector<16x128xf32>, vector<128x128xf32>, vector<16x128xf32> -> vector<16x128xf32>
    %c1 = arith.constant 1 : index
    %c0_6 = arith.constant 0 : index
    %c0_7 = arith.constant 0 : index
    %7 = vector.load %arg2[%c1, %c0_6, %c0_7] : memref<3x128x128xf32, #tpu.memory_space<vmem>>, vector<1x128x128xf32>
    %8 = vector.shape_cast %7 : vector<1x128x128xf32> to vector<128x128xf32>
    %cst_8 = arith.constant dense<0.000000e+00> : vector<16x128xf32>
    %9 = tpu.matmul %3, %8, %cst_8 {dimension_numbers = #tpu.dot_dimension_numbers<[1], [0], [0], [1], [0, 0, 1, 1], [], []>} : vector<16x128xf32>, vector<128x128xf32>, vector<16x128xf32> -> vector<16x128xf32>
    %c2 = arith.constant 2 : index
    %c0_9 = arith.constant 0 : index
    %c0_10 = arith.constant 0 : index
    %10 = vector.load %arg2[%c2, %c0_9, %c0_10] : memref<3x128x128xf32, #tpu.memory_space<vmem>>, vector<1x128x128xf32>
    %11 = vector.shape_cast %10 : vector<1x128x128xf32> to vector<128x128xf32>
    %cst_11 = arith.constant dense<0.000000e+00> : vector<16x128xf32>
    %12 = tpu.matmul %3, %11, %cst_11 {dimension_numbers = #tpu.dot_dimension_numbers<[1], [0], [0], [1], [0, 0, 1, 1], [], []>} : vector<16x128xf32>, vector<128x128xf32>, vector<16x128xf32> -> vector<16x128xf32>
    %13 = tpu.iota {dimensions = array<i32: 0>} : vector<16x1xi32>
    %c16_i32 = arith.constant 16 : i32
    %c0_i32 = arith.constant 0 : i32
    %14 = arith.cmpi eq, %c16_i32, %c0_i32 : i32
    %c1_i32 = arith.constant 1 : i32
    %15 = arith.select %14, %c1_i32, %c16_i32 : i32
    %16 = vector.broadcast %15 : i32 to vector<16x1xi32>
    %17 = arith.remsi %13, %16 : vector<16x1xi32>
    %c0_i32_12 = arith.constant 0 : i32
    %18 = vector.broadcast %c0_i32_12 : i32 to vector<16x1xi32>
    %19 = arith.cmpi ne, %17, %18 : vector<16x1xi32>
    %c0_i32_13 = arith.constant 0 : i32
    %20 = vector.broadcast %c0_i32_13 : i32 to vector<16x1xi32>
    %21 = arith.cmpi slt, %17, %20 : vector<16x1xi32>
    %c0_i32_14 = arith.constant 0 : i32
    %22 = arith.cmpi slt, %15, %c0_i32_14 : i32
    %23 = vector.broadcast %22 : i1 to vector<16x1xi1>
    %24 = vector.broadcast %23 : vector<16x1xi1> to vector<16x1xi1>
    %25 = arith.xori %21, %24 : vector<16x1xi1>
    %26 = arith.andi %25, %19 : vector<16x1xi1>
    %27 = vector.broadcast %15 : i32 to vector<16x1xi32>
    %28 = arith.addi %17, %27 : vector<16x1xi32>
    %29 = arith.select %26, %28, %17 : vector<16x1xi1>, vector<16x1xi32>
    %cst_15 = arith.constant 0.000000e+00 : f32
    %30 = vector.broadcast %cst_15 : f32 to vector<1x128xf32>
    %31 = vector.extract_strided_slice %6 {offsets = [0, 0], sizes = [15, 128], strides = [1, 1]} : vector<16x128xf32> to vector<15x128xf32>
    %32 = tpu.concatenate %30, %31 in 0 : vector<1x128xf32>, vector<15x128xf32> -> vector<16x128xf32>
    %c1_i32_16 = arith.constant 1 : i32
    %33 = vector.broadcast %c1_i32_16 : i32 to vector<16x1xi32>
    %34 = arith.cmpi sge, %29, %33 : vector<16x1xi32>
    %cst_17 = arith.constant 0.000000e+00 : f32
    %35 = vector.shape_cast %34 : vector<16x1xi1> to vector<16x1xi1>
    %36 = vector.broadcast %35 : vector<16x1xi1> to vector<16x128xi1>
    %37 = vector.broadcast %cst_17 : f32 to vector<16x128xf32>
    %38 = arith.select %36, %32, %37 : vector<16x128xi1>, vector<16x128xf32>
    %39 = arith.addf %9, %38 : vector<16x128xf32>
    %40 = vector.extract_strided_slice %12 {offsets = [1, 0], sizes = [15, 128], strides = [1, 1]} : vector<16x128xf32> to vector<15x128xf32>
    %cst_18 = arith.constant 0.000000e+00 : f32
    %41 = vector.broadcast %cst_18 : f32 to vector<1x128xf32>
    %42 = tpu.concatenate %40, %41 in 0 : vector<15x128xf32>, vector<1x128xf32> -> vector<16x128xf32>
    %c15_i32 = arith.constant 15 : i32
    %43 = vector.broadcast %c15_i32 : i32 to vector<16x1xi32>
    %44 = arith.cmpi slt, %29, %43 : vector<16x1xi32>
    %cst_19 = arith.constant 0.000000e+00 : f32
    %45 = vector.shape_cast %44 : vector<16x1xi1> to vector<16x1xi1>
    %46 = vector.broadcast %45 : vector<16x1xi1> to vector<16x128xi1>
    %47 = vector.broadcast %cst_19 : f32 to vector<16x128xf32>
    %48 = arith.select %46, %42, %47 : vector<16x128xi1>, vector<16x128xf32>
    %49 = arith.addf %39, %48 : vector<16x128xf32>
    %c0_20 = arith.constant 0 : index
    %c0_21 = arith.constant 0 : index
    %50 = vector.load %arg3[%c0_20, %c0_21] : memref<1x128xf32, #tpu.memory_space<vmem>>, vector<1x128xf32>
    %51 = vector.broadcast %50 : vector<1x128xf32> to vector<16x128xf32>
    %52 = arith.addf %49, %51 : vector<16x128xf32>
    %53 = vector.shape_cast %52 : vector<16x128xf32> to vector<1x16x128xf32>
    %c0_22 = arith.constant 0 : index
    %c0_23 = arith.constant 0 : index
    %c0_24 = arith.constant 0 : index
    %54 = vector.load %arg4[%c0_22, %c0_23, %c0_24] : memref<1x16x128xf32, #tpu.memory_space<vmem>>, vector<1x16x128xf32>
    tpu.vector_store %arg4[%c0_22, %c0_23, %c0_24], %53 {strides = array<i32>} : memref<1x16x128xf32, #tpu.memory_space<vmem>>, vector<1x16x128xf32>,
    return
  }
  func.func @transform_0(%arg0: i32) -> (i32, i32, i32) {
    %c0_i32 = arith.constant 0 : i32
    %c0_i32_0 = arith.constant 0 : i32
    %c0_i32_1 = arith.constant 0 : i32
    return %arg0, %c0_i32, %c0_i32_0 : i32, i32, i32
  }
  func.func @transform_1(%arg0: i32) -> (i32, i32, i32) {
    %c0_i32 = arith.constant 0 : i32
    %c0_i32_0 = arith.constant 0 : i32
    %c0_i32_1 = arith.constant 0 : i32
    %c0_i32_2 = arith.constant 0 : i32
    return %c0_i32, %c0_i32_0, %c0_i32_1 : i32, i32, i32
  }
  func.func @transform_2(%arg0: i32) -> (i32, i32) {
    %c0_i32 = arith.constant 0 : i32
    %c0_i32_0 = arith.constant 0 : i32
    %c0_i32_1 = arith.constant 0 : i32
    return %c0_i32, %c0_i32_0 : i32, i32
  }
  func.func @transform_3(%arg0: i32) -> (i32, i32, i32) {
    %c0_i32 = arith.constant 0 : i32
    %c0_i32_0 = arith.constant 0 : i32
    %c0_i32_1 = arith.constant 0 : i32
    return %arg0, %c0_i32, %c0_i32_0 : i32, i32, i32
  }
}

module attributes {stable_mosaic.version = 11 : i64} {
  func.func @_linear_kernel(%arg0: i32, %arg1: memref<2x2048xf32, #tpu.memory_space<vmem>>, %arg2: memref<2048x10xf32, #tpu.memory_space<vmem>>, %arg3: memref<1x10xf32, #tpu.memory_space<vmem>>, %arg4: memref<2x10xf32, #tpu.memory_space<vmem>>) attributes {dimension_semantics = [#tpu.dimension_semantics<arbitrary>], iteration_bounds = array<i64: 1>, scalar_prefetch = 0 : i64, scratch_operands = 0 : i64, tpu.core_type = #tpu.core_type<tc>, window_params = [{pipeline_mode = #tpu.pipeline_mode<synchronous>, transform_indices = @transform_0, window_bounds = array<i64: 2, 2048>}, {pipeline_mode = #tpu.pipeline_mode<synchronous>, transform_indices = @transform_1, window_bounds = array<i64: 2048, 10>}, {pipeline_mode = #tpu.pipeline_mode<synchronous>, transform_indices = @transform_2, window_bounds = array<i64: 1, 10>}, {pipeline_mode = #tpu.pipeline_mode<synchronous>, transform_indices = @transform_3, window_bounds = array<i64: 2, 10>}]} {
    %c0 = arith.constant 0 : index
    %c0_0 = arith.constant 0 : index
    %0 = vector.load %arg1[%c0, %c0_0] : memref<2x2048xf32, #tpu.memory_space<vmem>>, vector<2x2048xf32>
    %cst = arith.constant 0.000000e+00 : f32
    %1 = vector.broadcast %cst : f32 to vector<2x2048xf32>
    %2 = arith.maximumf %0, %1 : vector<2x2048xf32>
    %c0_1 = arith.constant 0 : index
    %c0_2 = arith.constant 0 : index
    %3 = vector.load %arg2[%c0_1, %c0_2] : memref<2048x10xf32, #tpu.memory_space<vmem>>, vector<2048x10xf32>
    %cst_3 = arith.constant dense<0.000000e+00> : vector<2x10xf32>
    %4 = tpu.matmul %2, %3, %cst_3 {dimension_numbers = #tpu.dot_dimension_numbers<[1], [0], [0], [1], [0, 0, 1, 1], [], []>} : vector<2x2048xf32>, vector<2048x10xf32>, vector<2x10xf32> -> vector<2x10xf32>
    %c0_4 = arith.constant 0 : index
    %c0_5 = arith.constant 0 : index
    %5 = vector.load %arg3[%c0_4, %c0_5] : memref<1x10xf32, #tpu.memory_space<vmem>>, vector<1x10xf32>
    %6 = vector.broadcast %5 : vector<1x10xf32> to vector<2x10xf32>
    %7 = arith.addf %4, %6 : vector<2x10xf32>
    %c0_6 = arith.constant 0 : index
    %c0_7 = arith.constant 0 : index
    %8 = vector.load %arg4[%c0_6, %c0_7] : memref<2x10xf32, #tpu.memory_space<vmem>>, vector<2x10xf32>
    tpu.vector_store %arg4[%c0_6, %c0_7], %7 {strides = array<i32>} : memref<2x10xf32, #tpu.memory_space<vmem>>, vector<2x10xf32>,
    return
  }
  func.func @transform_0(%arg0: i32) -> (i32, i32) {
    %c0_i32 = arith.constant 0 : i32
    %c0_i32_0 = arith.constant 0 : i32
    %c0_i32_1 = arith.constant 0 : i32
    return %c0_i32, %c0_i32_0 : i32, i32
  }
  func.func @transform_1(%arg0: i32) -> (i32, i32) {
    %c0_i32 = arith.constant 0 : i32
    %c0_i32_0 = arith.constant 0 : i32
    %c0_i32_1 = arith.constant 0 : i32
    return %c0_i32, %c0_i32_0 : i32, i32
  }
  func.func @transform_2(%arg0: i32) -> (i32, i32) {
    %c0_i32 = arith.constant 0 : i32
    %c0_i32_0 = arith.constant 0 : i32
    %c0_i32_1 = arith.constant 0 : i32
    return %c0_i32, %c0_i32_0 : i32, i32
  }
  func.func @transform_3(%arg0: i32) -> (i32, i32) {
    %c0_i32 = arith.constant 0 : i32
    %c0_i32_0 = arith.constant 0 : i32
    %c0_i32_1 = arith.constant 0 : i32
    return %c0_i32, %c0_i32_0 : i32, i32
  }
}

</mosaic_0001>

<bundles_post_ra>
// kernel: _record_forward.4
= control target key start
LH: loop header
LB: loop body
LE: loop exit
PB: predicated region body
PF: predicated region fallthrough
CT: control target
= control target key end

     0   :  { %s916_s12 = smov 0   ;;  %s1098_s0 = inlined_call_operand.vmem [shape: f32[2,16,128], index: 0, kind: input, shape index: {}]   ;;  %s1099_s1 = inlined_call_operand.vmem [shape: f32[3,128,128], index: 1, kind: input, shape index: {}]   ;;  %s1100_s2 = inlined_call_operand.vmem [shape: f32[1,128], index: 2, kind: input, shape index: {}]   ;;  %s1101_s3 = inlined_call_operand.vmem [shape: f32[2,16,128], index: 3, kind: output, shape index: {}]  }
   0x1 LB: > { %s579_s13 = sadd.s32 4294967295, %s894_s12   ;;  %p583_p0 = scmp.ge.s32.totalorder %s894_s12, 1  ;;  %s894_s12 = sphi %s916_s12, %s13_s12  }
   0x2   : > { %p137_p1 = scmp.lt.s32.totalorder %s894_s12, 3 }
   0x4   : > { %p138_p2 = pnand %p583_p0, %p137_p1 }
   0x5   : > { %v175_v0 = vld [vmem:[%s1099_s1] sm:$0xff] (!%p138_p2)  ;;  %v176_v1 = vld [vmem:[%s1099_s1 + $0x8] sm:$0xff] (!%p138_p2)  ;;  %v177_v2 = vld [vmem:[%s1099_s1 + $0x10] sm:$0xff] (!%p138_p2)  ;;  %p161_p3 = scmp.lt.s32.totalorder (!%p138_p2), %s579_s13, 1  ;;  %vm404_vm0 = vcmask (!%p138_p2), 1040384   ;;  %vm496_vm1 = vcmask (!%p138_p2), 1046528  }
   0x6   : > { %141 = sbr.rel (%p138_p2) target bundleno = 292 (0x124), region = 32  ;;  %v784_v3 = vpack.c.bf16 (!%p138_p2), %v176_v1, %v175_v0  ;;  %v178_v4 = vld [vmem:[%s1099_s1 + $0x18] sm:$0xff] (!%p138_p2)  ;;  %v179_v6 = vld [vmem:[%s1099_s1 + $0x20] sm:$0xff] (!%p138_p2)  ;;  %v180_v7 = vld [vmem:[%s1099_s1 + $0x28] sm:$0xff] (!%p138_p2) }
   0x7   : > { %v788_v5 = vpack.c.bf16 (!%p138_p2), %v178_v4, %v177_v2  ;;  %v792_v8 = vpack.c.bf16 (!%p138_p2), %v180_v7, %v179_v6  ;;  %v604_v9 = vld [vmem:[%s1099_s1 + $0x100] sm:$0xff] (!%p138_p2)  ;;  %v605_v10 = vld [vmem:[%s1099_s1 + $0x108] sm:$0xff] (!%p138_p2)  ;;  %v181_v11 = vld [vmem:[%s1099_s1 + $0x30] sm:$0xff] (!%p138_p2) }
   0x8   : > { %785 = vmatprep.subr.bf16.mxu0 (!%p138_p2), %v784_v3  ;;  %v182_v12 = vld [vmem:[%s1099_s1 + $0x38] sm:$0xff] (!%p138_p2)  ;;  %v816_v13 = vpack.c.bf16 (!%p138_p2), %v605_v10, %v604_v9  ;;  %v606_v16 = vld [vmem:[%s1099_s1 + $0x110] sm:$0xff] (!%p138_p2)  ;;  %v608_v19 = vld [vmem:[%s1099_s1 + $0x120] sm:$0xff] (!%p138_p2) }
   0x9   : > { %787 = vmatpush3.bf16.msra.mxu0 (!%p138_p2), %v784_v3  ;;  %v607_v17 = vld [vmem:[%s1099_s1 + $0x118] sm:$0xff] (!%p138_p2)  ;;  %v796_v20 = vpack.c.bf16 (!%p138_p2), %v182_v12, %v181_v11  ;;  %v609_v21 = vld [vmem:[%s1099_s1 + $0x128] sm:$0xff] (!%p138_p2)  ;;  %v183_v22 = vld [vmem:[%s1099_s1 + $0x40] sm:$0xff] (!%p138_p2) }
   0xa   : > { %789 = vmatprep.subr.bf16.mxu0 (!%p138_p2), %v788_v5  ;;  %817 = vmatprep.subr.bf16.mxu1 (!%p138_p2), %v816_v13  ;;  %v820_v18 = vpack.c.bf16 (!%p138_p2), %v607_v17, %v606_v16  ;;  %v184_v23 = vld [vmem:[%s1099_s1 + $0x48] sm:$0xff] (!%p138_p2)  ;;  %v824_v24 = vpack.c.bf16 (!%p138_p2), %v609_v21, %v608_v19  ;;  %v610_v25 = vld [vmem:[%s1099_s1 + $0x130] sm:$0xff] (!%p138_p2)  ;;  %v611_v26 = vld [vmem:[%s1099_s1 + $0x138] sm:$0xff] (!%p138_p2) }
   0xb   : > { %819 = vmatpush3.bf16.msra.mxu1 (!%p138_p2), %v816_v13  ;;  %v800_v27 = vpack.c.bf16 (!%p138_p2), %v184_v23, %v183_v22  ;;  %v185_v28 = vld [vmem:[%s1099_s1 + $0x50] sm:$0xff] (!%p138_p2)  ;;  %v186_v29 = vld [vmem:[%s1099_s1 + $0x58] sm:$0xff] (!%p138_p2)  ;;  %v828_v30 = vpack.c.bf16 (!%p138_p2), %v611_v26, %v610_v25  ;;  %v612_v31 = vld [vmem:[%s1099_s1 + $0x140] sm:$0xff] (!%p138_p2)  ;;  %v375_v22 = vlaneseq (!%p138_p2) }
   0xc   : > { %821 = vmatprep.subr.bf16.mxu1 (!%p138_p2), %v820_v18  ;;  %v613_v32 = vld [vmem:[%s1099_s1 + $0x148] sm:$0xff] (!%p138_p2)  ;;  %v804_v33 = vpack.c.bf16 (!%p138_p2), %v186_v29, %v185_v28  ;;  %v187_v34 = vld [vmem:[%s1099_s1 + $0x60] sm:$0xff] (!%p138_p2)  ;;  %v614_v37 = vld [vmem:[%s1099_s1 + $0x150] sm:$0xff] (!%p138_p2) }
   0xd   : > { %s1103_s13 = smov (!%p161_p3, %s579_s13), 1  ;;  %791 = vmatpush3.bf16.msra.mxu0 %v788_v5  ;;  %v188_v35 = vld [vmem:[%s1099_s1 + $0x68] sm:$0xff]  ;;  %v832_v36 = vpack.c.bf16 %v613_v32, %v612_v31  ;;  %v615_v38 = vld [vmem:[%s1099_s1 + $0x158] sm:$0xff]  ;;  %v189_v40 = vld [vmem:[%s1099_s1 + $0x70] sm:$0xff]  ;;  %v376_v23 = vshrl.u32 %v375_v22, 7 }
   0xe   : > { %s623_s26 = sshll.u32 %s1103_s13, 4  ;;  %793 = vmatprep.subr.bf16.mxu0 %v792_v8  ;;  %v808_v39 = vpack.c.bf16 %v188_v35, %v187_v34  ;;  %v190_v41 = vld [vmem:[%s1099_s1 + $0x78] sm:$0xff]  ;;  %v836_v42 = vpack.c.bf16 %v615_v38, %v614_v37  ;;  %v616_v43 = vld [vmem:[%s1099_s1 + $0x160] sm:$0xff]  ;;  %v617_v44 = vld [vmem:[%s1099_s1 + $0x168] sm:$0xff] }
   0xf   : > { %s956_s6 = scalar_lea.vmem %s1098_s0, %s623_s26  ;;  %823 = vmatpush3.bf16.msra.mxu1 %v820_v18  ;;  %v812_v45 = vpack.c.bf16 %v190_v41, %v189_v40  ;;  %v588_v46 = vld [vmem:[%s1099_s1 + $0x80] sm:$0xff]  ;;  %v589_v47 = vld [vmem:[%s1099_s1 + $0x88] sm:$0xff]  ;;  %v840_v48 = vpack.c.bf16 %v617_v44, %v616_v43  ;;  %v618_v50 = vld [vmem:[%s1099_s1 + $0x170] sm:$0xff]  ;;  %v382_v26 = vand.u32 15, %v376_v23  ;;  %s170_s22 = scalar_lea.vmem %s1101_s3, %s623_s26 }
  0x10   : > { %v171_v14 = vld [vmem:[%s956_s6] sm:$0xff]  ;;  %825 = vmatprep.subr.bf16.mxu1 %v824_v24  ;;  %v172_v49 = vld [vmem:[%s956_s6 + $0x8] sm:$0xff]  ;;  %v619_v51 = vld [vmem:[%s1099_s1 + $0x178] sm:$0xff]  ;;  %v848_v52 = vpack.c.bf16 %v589_v47, %v588_v46 }
  0x11   : > { %v965_v15 = vmax.f32 %v171_v14, 0.0  ;;  %795 = vmatpush3.bf16.msra.mxu0 %v792_v8  ;;  %v590_v53 = vld [vmem:[%s1099_s1 + $0x90] sm:$0xff]  ;;  %v591_v54 = vld [vmem:[%s1099_s1 + $0x98] sm:$0xff]  ;;  %v174_v55 = vmax.f32 %v172_v49, 0.0  ;;  %v844_v56 = vpack.c.bf16 %v619_v51, %v618_v50  ;;  %v592_v58 = vld [vmem:[%s1099_s1 + $0xa0] sm:$0xff]  ;;  %vm411_vm3 = vcmp.ge.s32.totalorder %v382_v26, 1 }
  0x12   : > { %797 = vmatprep.subr.bf16.mxu0 %v796_v20  ;;  %v852_v57 = vpack.c.bf16 %v591_v54, %v590_v53  ;;  %v593_v59 = vld [vmem:[%s1099_s1 + $0xa8] sm:$0xff]  ;;  %v594_v61 = vld [vmem:[%s1099_s1 + $0xb0] sm:$0xff]  ;;  %v595_v62 = vld [vmem:[%s1099_s1 + $0xb8] sm:$0xff] }
  0x13   : > { %711 = vmatprep.mubr.f32.mxu0 %v965_v15  ;;  %746 = vmatprep.mubr.f32.mxu1 %v965_v15  ;;  %v856_v60 = vpack.c.bf16 %v593_v59, %v592_v58  ;;  %v860_v63 = vpack.c.bf16 %v595_v62, %v594_v61  ;;  %v596_v0 = vld [vmem:[%s1099_s1 + $0xc0] sm:$0xff]  ;;  %v597_v1 = vld [vmem:[%s1099_s1 + $0xc8] sm:$0xff]  ;;  %v598_v3 = vld [vmem:[%s1099_s1 + $0xd0] sm:$0xff] }
  0x14   : > { %827 = vmatpush3.bf16.msra.mxu1 %v824_v24  ;;  %v864_v2 = vpack.c.bf16 %v597_v1, %v596_v0  ;;  %v599_v4 = vld [vmem:[%s1099_s1 + $0xd8] sm:$0xff]  ;;  %v600_v6 = vld [vmem:[%s1099_s1 + $0xe0] sm:$0xff]  ;;  %v601_v7 = vld [vmem:[%s1099_s1 + $0xe8] sm:$0xff]  ;;  %v377_v24 = vadd.s32 8, %v376_v23 }
  0x15   : > { %799 = vmatpush3.bf16.msra.mxu0 %v796_v20  ;;  %829 = vmatprep.subr.bf16.mxu1 %v828_v30  ;;  %v868_v5 = vpack.c.bf16 %v599_v4, %v598_v3  ;;  %v872_v8 = vpack.c.bf16 %v601_v7, %v600_v6  ;;  %v602_v9 = vld [vmem:[%s1099_s1 + $0xf0] sm:$0xff]  ;;  %v603_v10 = vld [vmem:[%s1099_s1 + $0xf8] sm:$0xff]  ;;  %v620_v34 = vld [vmem:[%s1100_s2] ss:$0 sm:$0xff] }
  0x16   : > { %801 = vmatprep.subr.bf16.mxu0 %v800_v27  ;;  %v876_v11 = vpack.c.bf16 %v603_v10, %v602_v9  ;;  %v389_v25 = vand.u32 15, %v377_v24 }
  0x18   : > { %831 = vmatpush3.bf16.msra.mxu1 %v828_v30  ;;  %vm504_vm2 = vcmp.lt.s32.totalorder %v389_v25, 15 }
  0x19   : > { %803 = vmatpush3.bf16.msra.mxu0 %v800_v27  ;;  %833 = vmatprep.subr.bf16.mxu1 %v832_v36 }
  0x1a   : > { %805 = vmatprep.subr.bf16.mxu0 %v804_v33 }
  0x1c   : > { %835 = vmatpush3.bf16.msra.mxu1 %v832_v36 }
  0x1d   : > { %807 = vmatpush3.bf16.msra.mxu0 %v804_v33  ;;  %837 = vmatprep.subr.bf16.mxu1 %v836_v42 }
  0x1e   : > { %809 = vmatprep.subr.bf16.mxu0 %v808_v39 }
  0x20   : > { %839 = vmatpush3.bf16.msra.mxu1 %v836_v42 }
  0x21   : > { %811 = vmatpush3.bf16.msra.mxu0 %v808_v39  ;;  %841 = vmatprep.subr.bf16.mxu1 %v840_v48 }
  0x22   : > { %813 = vmatprep.subr.bf16.mxu0 %v812_v45 }
  0x24   : > { %843 = vmatpush3.bf16.msra.mxu1 %v840_v48 }
  0x25   : > { %815 = vmatpush3.bf16.msra.mxu0 %v812_v45  ;;  %845 = vmatprep.subr.bf16.mxu1 %v844_v56 }
  0x26   : > { %849 = vmatprep.subr.bf16.mxu0 %v848_v52 }
  0x28   : > { %712 = vmatmul.mubr.f32.vlgmr.msra.gmra.mrb[0].mxu0 %v174_v55  ;;  %847 = vmatpush3.bf16.msra.mxu1 %v844_v56 }
  0x29   : > { %851 = vmatpush3.bf16.msra.mxu0 %v848_v52  ;;  %781 = vmatprep.mubr.f32.mxu0 %v965_v15 }
  0x2a   : > { %853 = vmatprep.subr.bf16.mxu0 %v852_v57 }
  0x2b   : > { %747 = vmatmul.mubr.f32.vlgmr.msra.gmra.mrb[0].mxu1 %v174_v55 }
  0x2d   : > { %855 = vmatpush3.bf16.msra.mxu0 %v852_v57 }
  0x2e   : > { %857 = vmatprep.subr.bf16.mxu0 %v856_v60 }
  0x31   : > { %859 = vmatpush3.bf16.msra.mxu0 %v856_v60 }
  0x32   : > { %861 = vmatprep.subr.bf16.mxu0 %v860_v63 }
  0x35   : > { %863 = vmatpush3.bf16.msra.mxu0 %v860_v63 }
  0x36   : > { %865 = vmatprep.subr.bf16.mxu0 %v864_v2 }
  0x39   : > { %867 = vmatpush3.bf16.msra.mxu0 %v864_v2 }
  0x3a   : > { %869 = vmatprep.subr.bf16.mxu0 %v868_v5 }
  0x3d   : > { %871 = vmatpush3.bf16.msra.mxu0 %v868_v5 }
  0x3e   : > { %873 = vmatprep.subr.bf16.mxu0 %v872_v8 }
  0x41   : > { %875 = vmatpush3.bf16.msra.mxu0 %v872_v8 }
  0x42   : > { %877 = vmatprep.subr.bf16.mxu0 %v876_v11 }
  0x45   : > { %879 = vmatpush3.bf16.msra.mxu0 %v876_v11 }
  0x48   : > { %782 = vmatmul.mubr.f32.vlgmr.msra.gmra.mrb[2].mxu0 %v174_v55 }
  0xfb   : > { %v713_v12 = vpop.f32.mrb[0].mxu0 }
  0xfc   : > { %v406_v13 = vrot.slane %v713_v12, 7  ;;  %v257_v14 = vpop.f32.mrb[1].mxu0 }
  0xfd   : > { %v405_v15 = vrot.slane %v257_v14, 7 }
  0xfe   : > { %v748_v17 = vpop.f32.mrb[0].mxu1 }
  0xff   : > { %v407_v16 = vsel %vm404_vm0, %v405_v15, %v406_v13  ;;  %v498_v18 = vrot.slane %v748_v17, 1  ;;  %v366_v19 = vpop.f32.mrb[1].mxu1  ;;  %v410_v28 = vsel %vm404_vm0, 0.0, %v405_v15 }
 0x100   : > { %v497_v20 = vrot.slane %v366_v19, 1  ;;  %v417_v32 = vsel %vm411_vm3, %v410_v28, 0.0 }
 0x101   : > { %v502_v27 = vsel %vm496_vm1, %v498_v18, 0.0 }
 0x102   : > { %v499_v21 = vsel %vm496_vm1, %v497_v20, %v498_v18  ;;  %v510_v30 = vsel %vm504_vm2, %v502_v27, 0.0 }
 0x11b   : > { %v783_v29 = vpop.f32.mrb[2].mxu0 }
 0x11c   : > { %v491_v31 = vadd.f32 %v783_v29, %v407_v16  ;;  %v485_v33 = vpop.f32.mrb[3].mxu0 }
 0x11d   : > { %v486_v35 = vadd.f32 %v485_v33, %v417_v32 }
 0x11e   : > { %v512_v36 = vadd.f32 %v510_v30, %v491_v31 }
 0x11f   : > { %v511_v37 = vadd.f32 %v499_v21, %v486_v35 }
 0x120   : > { %v521_v38 = vadd.f32 %v620_v34, %v512_v36 }
 0x121   : > { %v520_v39 = vadd.f32 %v620_v34, %v511_v37 }
 0x122   : > { %523 = vst [vmem:[%s170_s22 + $0x8] sm:$0xff] %v521_v38 }
 0x123   : > { %522 = vst [vmem:[%s170_s22] sm:$0xff] %v520_v39 }
 0x124 PF: > { %s13_s12 = sadd.s32 1, %s894_s12  }
 0x125   : > { %p10_p4 = scmp.ge.s32.totalorder %s13_s12, 4  }
 0x127   :  { %12 = sbr.rel (!%p10_p4) target bundleno = 1 (0x1), region = 64 }

// kernel: _record_forward.3
= control target key start
LH: loop header
LB: loop body
LE: loop exit
PB: predicated region body
PF: predicated region fallthrough
CT: control target
= control target key end

     0   :  { %8 = vsyncpa [#allocation3], 0  ;;  %s828_s12 = smov 0   ;;  %s904_s0 = inlined_call_operand.vmem [shape: f32[2,16,64], index: 0, kind: input, shape index: {}]   ;;  %s905_s1 = inlined_call_operand.hbm [shape: f32[3,64,128], index: 1, kind: input, shape index: {}]   ;;  %s906_s2 = inlined_call_operand.vmem [shape: f32[1,128], index: 2, kind: input, shape index: {}]   ;;  %s907_s3 = inlined_call_operand.vmem [shape: f32[2,16,128], index: 3, kind: output, shape index: {}]  }
   0x1 LB: > { %s834_s13 = sadd.s32 4294967295, %s803_s12   ;;  %p589_p0 = scmp.ge.s32.totalorder %s803_s12, 1  ;;  %s803_s12 = sphi %s828_s12, %s14_s12  }
   0x2   : > { %p113_p1 = scmp.lt.s32.totalorder %s803_s12, 3  ;;  %s805_s14 = smov [#allocation2]  }
   0x3   : > { %s125_s15 = sshll.u32 %s805_s14, 4  ;;  %p908_p3 = scmp.eq.s32.totalorder %s834_s13, 0  ;;  %s126_s15 = int_to_ptr.vmem [resolvable:$true] %s125_s15 }
   0x4   : > { %p838_p2 = pnand %p589_p0, %p113_p1  ;;  %s765_s20 = scalar_lea.hbm %s905_s1, 3072 }
   0x5   : > { %p766_p6 = scmp.ne.s32.totalorder %s905_s1, %s765_s20  ;;  %p772_p10 = scmp.lt.u32.totalorder %s765_s20, %s905_s1 }
   0x6   : > { %s910_s16 = scalar_select %p838_p2, 1, 0 }
   0x7   : > { %p748_p4 = pneg %p838_p2 }
   0x9   : > { %p847_p5 = pnand %p908_p3, %p748_p4 }
   0xb   : > { %p767_p7 = pneg %p847_p5 }
   0xd   : > { %p768_p8 = pnand %p767_p7, %p766_p6 }
   0xf   : > { %p769_p9 = pneg %p768_p8 }
  0x11   : > { %p774_p11 = pnand %p772_p10, %p769_p9 }
  0x13   : > { %777 = shalt.err (!%p774_p11)
}
  0x14   : > { %s778_s25 = scalar_lea.vmem %s126_s15, 3072  ;;  %p786_p1 = scmp.lt.s32.totalorder %s126_s15, %s126_s15 }
  0x15   : > { %p779_p12 = scmp.ne.s32.totalorder %s126_s15, %s778_s25  ;;  %p787_p4 = scmp.lt.s32.totalorder %s778_s25, %s778_s25 }
  0x17   : > { %p781_p13 = pnand %p779_p12, %p767_p7  ;;  %p788_p3 = por %p787_p4, %p786_p1 }
  0x19   : > { %p782_p0 = pneg %p781_p13 }
  0x1b   : > { %p789_p2 = pnand %p788_p3, %p782_p0 }
  0x1d   : > { %792 = shalt.err (!%p789_p2)
}
  0x1e   : > { %s806_s26 = smov 128   ;;  %s807_s27 = smov 8  }
  0x1f   : > { %751 = dma.hbm_to_vmem [thread:$0]  (!%p847_p5), %s905_s1, 3072, %s126_s15, [#allocation3], %s806_s26, %s806_s26, %s807_s27  }
  0x20   : > { %p912_p6 = scmp.ne.s32.totalorder %s910_s16, 0 }
  0x21   : > { %p913_p8 = scmp.eq.s32.totalorder (!%p912_p6), %s834_s13, 0 }
  0x22   : > { %152 = sbr.rel (%p912_p6) target bundleno = 297 (0x129), region = 32 }
  0x29   : > { %798 = dma.done.wait (%p913_p8), [#allocation3], 3072   ;;  %p914_p7 = pmov %p913_p8 }
  0x2a   : > { %p176_p2 = scmp.lt.s32.totalorder %s834_s13, 1  ;;  %v188_v0 = vld [vmem:[#allocation2] sm:$0xff]  ;;  %v189_v1 = vld [vmem:[#allocation2 + $0x8] sm:$0xff]  ;;  %v190_v2 = vld [vmem:[#allocation2 + $0x10] sm:$0xff]  ;;  %vm196_vm0 = vcmask 523264   ;;  %v371_v38 = vlaneseq  ;;  %vm400_vm1 = vcmask 1040384  }
  0x2b   : > { %800 = vsyncadd (%p914_p7), [#allocation3], 4294964224  ;;  %v696_v3 = vpack.c.bf16 %v189_v1, %v188_v0  ;;  %v191_v4 = vld [vmem:[#allocation2 + $0x18] sm:$0xff]  ;;  %v192_v6 = vld [vmem:[#allocation2 + $0x20] sm:$0xff]  ;;  %vm492_vm2 = vcmask 1046528  }
  0x2c   : > { %s916_s13 = smov (!%p176_p2, %s834_s13), 1  ;;  %v700_v5 = vpack.c.bf16 %v191_v4, %v190_v2  ;;  %v193_v7 = vld [vmem:[#allocation2 + $0x28] sm:$0xff]  ;;  %v288_v8 = vld [vmem:[#allocation2 + $0x80] sm:$0xff]  ;;  %v290_v12 = vld [vmem:[#allocation2 + $0x90] sm:$0xff]  ;;  %v372_v44 = vshrl.u32 %v371_v38, 7 }
  0x2d   : > { %s607_s30 = sshll.u32 %s916_s13, 4  ;;  %697 = vmatprep.subr.bf16.mxu0 %v696_v3  ;;  %v289_v9 = vld [vmem:[#allocation2 + $0x88] sm:$0xff]  ;;  %v704_v13 = vpack.c.bf16 %v193_v7, %v192_v6  ;;  %v194_v14 = vld [vmem:[#allocation2 + $0x30] sm:$0xff]  ;;  %v291_v15 = vld [vmem:[#allocation2 + $0x98] sm:$0xff] }
  0x2e   : > { %s883_s6 = scalar_lea.vmem %s904_s0, %s607_s30  ;;  %699 = vmatpush3.bf16.msra.mxu0 %v696_v3  ;;  %v712_v11 = vpack.c.bf16 %v289_v9, %v288_v8  ;;  %v195_v16 = vld [vmem:[#allocation2 + $0x38] sm:$0xff]  ;;  %v716_v17 = vpack.c.bf16 %v291_v15, %v290_v12  ;;  %v292_v18 = vld [vmem:[#allocation2 + $0xa0] sm:$0xff]  ;;  %v293_v19 = vld [vmem:[#allocation2 + $0xa8] sm:$0xff]  ;;  %v373_v49 = vadd.s32 8, %v372_v44  ;;  %v378_v52 = vand.u32 15, %v372_v44  ;;  %s185_s11 = scalar_lea.vmem %s907_s3, %s607_s30 }
  0x2f   : > { %v186_v10 = vld [vmem:[%s883_s6] sm:$0xff]  ;;  %701 = vmatprep.subr.bf16.mxu0 %v700_v5  ;;  %v720_v20 = vpack.c.bf16 %v293_v19, %v292_v18  ;;  %v708_v21 = vpack.c.bf16 %v195_v16, %v194_v14  ;;  %v294_v22 = vld [vmem:[#allocation2 + $0xb0] sm:$0xff]  ;;  %v295_v23 = vld [vmem:[#allocation2 + $0xb8] sm:$0xff] }
  0x30   : > { %655 = vmatprep.mubr.msk.f32.mxu0 %vm196_vm0, %v186_v10  ;;  %674 = vmatprep.mubr.msk.f32.mxu1 %vm196_vm0, %v186_v10  ;;  %v279_v24 = vld [vmem:[#allocation2 + $0x40] sm:$0xff]  ;;  %v280_v25 = vld [vmem:[#allocation2 + $0x48] sm:$0xff]  ;;  %v724_v26 = vpack.c.bf16 %v295_v23, %v294_v22  ;;  %v281_v28 = vld [vmem:[#allocation2 + $0x50] sm:$0xff]  ;;  %v385_v51 = vand.u32 15, %v373_v49  ;;  %vm407_vm4 = vcmp.ge.s32.totalorder %v378_v52, 1 }
  0x31   : > { %713 = vmatprep.subr.bf16.mxu1 %v712_v11  ;;  %v728_v27 = vpack.c.bf16 %v280_v25, %v279_v24  ;;  %v282_v29 = vld [vmem:[#allocation2 + $0x58] sm:$0xff]  ;;  %v187_v30 = vld [vmem:[%s883_s6 + $0x8] sm:$0xff]  ;;  %v283_v32 = vld [vmem:[#allocation2 + $0x60] sm:$0xff] }
  0x32   : > { %715 = vmatpush3.bf16.msra.mxu1 %v712_v11  ;;  %703 = vmatpush3.bf16.msra.mxu0 %v700_v5  ;;  %v732_v31 = vpack.c.bf16 %v282_v29, %v281_v28  ;;  %v284_v33 = vld [vmem:[#allocation2 + $0x68] sm:$0xff]  ;;  %v285_v35 = vld [vmem:[#allocation2 + $0x70] sm:$0xff]  ;;  %v286_v36 = vld [vmem:[#allocation2 + $0x78] sm:$0xff]  ;;  %vm500_vm3 = vcmp.lt.s32.totalorder %v385_v51, 15 }
  0x33   : > { %717 = vmatprep.subr.bf16.mxu1 %v716_v17  ;;  %705 = vmatprep.subr.bf16.mxu0 %v704_v13  ;;  %v736_v34 = vpack.c.bf16 %v284_v33, %v283_v32  ;;  %v740_v37 = vpack.c.bf16 %v286_v36, %v285_v35  ;;  %v604_v60 = vld [vmem:[%s906_s2] ss:$0 sm:$0xff] }
  0x36   : > { %719 = vmatpush3.bf16.msra.mxu1 %v716_v17  ;;  %707 = vmatpush3.bf16.msra.mxu0 %v704_v13 }
  0x37   : > { %721 = vmatprep.subr.bf16.mxu1 %v720_v20  ;;  %709 = vmatprep.subr.bf16.mxu0 %v708_v21 }
  0x3a   : > { %723 = vmatpush3.bf16.msra.mxu1 %v720_v20  ;;  %711 = vmatpush3.bf16.msra.mxu0 %v708_v21 }
  0x3b   : > { %725 = vmatprep.subr.bf16.mxu1 %v724_v26  ;;  %729 = vmatprep.subr.bf16.mxu0 %v728_v27 }
  0x3d   : > { %656 = vmatmul.mubr.msk.f32.vlgmr.msra.gmra.mrb[0].mxu0 %vm196_vm0, %v187_v30 }
  0x3e   : > { %727 = vmatpush3.bf16.msra.mxu1 %v724_v26  ;;  %731 = vmatpush3.bf16.msra.mxu0 %v728_v27 }
  0x3f   : > { %693 = vmatprep.mubr.msk.f32.mxu0 %vm196_vm0, %v186_v10  ;;  %733 = vmatprep.subr.bf16.mxu0 %v732_v31 }
  0x41   : > { %675 = vmatmul.mubr.msk.f32.vlgmr.msra.gmra.mrb[0].mxu1 %vm196_vm0, %v187_v30 }
  0x42   : > { %735 = vmatpush3.bf16.msra.mxu0 %v732_v31 }
  0x43   : > { %737 = vmatprep.subr.bf16.mxu0 %v736_v34 }
  0x46   : > { %739 = vmatpush3.bf16.msra.mxu0 %v736_v34 }
  0x47   : > { %741 = vmatprep.subr.bf16.mxu0 %v740_v37 }
  0x4a   : > { %743 = vmatpush3.bf16.msra.mxu0 %v740_v37 }
  0x4d   : > { %694 = vmatmul.mubr.msk.f32.vlgmr.msra.gmra.mrb[2].mxu0 %vm196_vm0, %v187_v30 }
 0x110   : > { %v657_v39 = vpop.f32.mrb[0].mxu0 }
 0x111   : > { %v402_v40 = vrot.slane %v657_v39, 7  ;;  %v269_v41 = vpop.f32.mrb[1].mxu0 }
 0x112   : > { %v401_v42 = vrot.slane %v269_v41, 7 }
 0x114   : > { %v676_v43 = vpop.f32.mrb[0].mxu1  ;;  %v403_v47 = vsel %vm400_vm1, %v401_v42, %v402_v40  ;;  %v406_v54 = vsel %vm400_vm1, 0.0, %v401_v42 }
 0x115   : > { %v494_v45 = vrot.slane %v676_v43, 1  ;;  %v362_v46 = vpop.f32.mrb[1].mxu1  ;;  %v413_v58 = vsel %vm407_vm4, %v406_v54, 0.0 }
 0x116   : > { %v493_v48 = vrot.slane %v362_v46, 1 }
 0x117   : > { %v498_v53 = vsel %vm492_vm2, %v494_v45, 0.0 }
 0x118   : > { %v495_v50 = vsel %vm492_vm2, %v493_v48, %v494_v45  ;;  %v506_v56 = vsel %vm500_vm3, %v498_v53, 0.0 }
 0x120   : > { %v695_v55 = vpop.f32.mrb[2].mxu0 }
 0x121   : > { %v487_v57 = vadd.f32 %v695_v55, %v403_v47  ;;  %v481_v59 = vpop.f32.mrb[3].mxu0 }
 0x122   : > { %v482_v61 = vadd.f32 %v481_v59, %v413_v58 }
 0x123   : > { %v508_v62 = vadd.f32 %v506_v56, %v487_v57 }
 0x124   : > { %v507_v63 = vadd.f32 %v495_v50, %v482_v61 }
 0x125   : > { %v517_v0 = vadd.f32 %v604_v60, %v508_v62 }
 0x126   : > { %v516_v1 = vadd.f32 %v604_v60, %v507_v63 }
 0x127   : > { %519 = vst [vmem:[%s185_s11 + $0x8] sm:$0xff] %v517_v0 }
 0x128   : > { %518 = vst [vmem:[%s185_s11] sm:$0xff] %v516_v1 }
 0x129 PF: > { %s14_s12 = sadd.s32 1, %s803_s12  }
 0x12a   : > { %p11_p3 = scmp.ge.s32.totalorder %s14_s12, 4  }
 0x12c   :  { %13 = sbr.rel (!%p11_p3) target bundleno = 1 (0x1), region = 69 }
 0x133   :  { %541 = vsyncpa [#allocation3], 1 }
 0x134   :  { %543 = vsyncpa [#allocation3 + $0x1], 1 }

// kernel: _record_forward.5
= control target key start
LH: loop header
LB: loop body
LE: loop exit
PB: predicated region body
PF: predicated region fallthrough
CT: control target
= control target key end

     0   :  { %v1513_v51 = vmov 1983009808   ;;  %v294_v53 = vlaneseq  ;;  %s2370_s0 = inlined_call_operand.vmem [shape: f32[2,2048], index: 0, kind: input, shape index: {}]   ;;  %s2371_s1 = inlined_call_operand.vmem [shape: f32[2048,10], index: 1, kind: input, shape index: {}]   ;;  %s2372_s2 = inlined_call_operand.vmem [shape: f32[1,10], index: 2, kind: input, shape index: {}]   ;;  %s2373_s3 = inlined_call_operand.hbm [shape: f32[2,10], index: 3, kind: output, shape index: {}]  }
   0x1   :  { %v39_v0 = vld [vmem:[%s2371_s1 + $0x80] sm:$0xff]  ;;  %v40_v1 = vld [vmem:[%s2371_s1 + $0x88] sm:$0xff]  ;;  %v41_v11 = vld [vmem:[%s2371_s1 + $0x90] sm:$0xff]  ;;  %v292_v52 = vunpack.c.l.s4 %v1513_v51 }
   0x2   :  { %v23_v2 = vld [vmem:[%s2371_s1] sm:$0xff]  ;;  %v1231_v3 = vpack.c.bf16 %v40_v1, %v39_v0  ;;  %v24_v4 = vld [vmem:[%s2371_s1 + $0x8] sm:$0xff]  ;;  %v42_v13 = vld [vmem:[%s2371_s1 + $0x98] sm:$0xff] }
   0x3   :  { %v71_v5 = vld [vmem:[%s2371_s1 + $0x180] sm:$0xff]  ;;  %v72_v6 = vld [vmem:[%s2371_s1 + $0x188] sm:$0xff]  ;;  %v1233_v7 = vpack.c.bf16 %v24_v4, %v23_v2  ;;  %v25_v14 = vld [vmem:[%s2371_s1 + $0x10] sm:$0xff]  ;;  %v1235_v16 = vpack.c.bf16 %v42_v13, %v41_v11  ;;  %v293_v2 = vunpack.c.0.s8 %v292_v52 }
   0x4   :  { %v1263_v8 = vpack.c.bf16 %v72_v6, %v71_v5  ;;  %v55_v9 = vld [vmem:[%s2371_s1 + $0x100] sm:$0xff]  ;;  %v56_v10 = vld [vmem:[%s2371_s1 + $0x108] sm:$0xff]  ;;  %1232 = vmatprep.subr.bf16.mxu0 %v1231_v3  ;;  %v26_v15 = vld [vmem:[%s2371_s1 + $0x18] sm:$0xff]  ;;  %v295_v3 = vshrl.u32 %v294_v53, 7 }
   0x5   :  { %v1265_v12 = vpack.c.bf16 %v56_v10, %v55_v9  ;;  %1234 = vmatpush3.bf16.msra.mxu0 %v1233_v7  ;;  %v1237_v17 = vpack.c.bf16 %v26_v15, %v25_v14  ;;  %v73_v18 = vld [vmem:[%s2371_s1 + $0x190] sm:$0xff]  ;;  %v74_v19 = vld [vmem:[%s2371_s1 + $0x198] sm:$0xff]  ;;  %v43_v23 = vld [vmem:[%s2371_s1 + $0xa0] sm:$0xff] }
   0x6   :  { %1264 = vmatprep.subr.bf16.mxu1 %v1263_v8  ;;  %v57_v20 = vld [vmem:[%s2371_s1 + $0x110] sm:$0xff]  ;;  %v1267_v21 = vpack.c.bf16 %v74_v19, %v73_v18  ;;  %v58_v22 = vld [vmem:[%s2371_s1 + $0x118] sm:$0xff]  ;;  %v44_v24 = vld [vmem:[%s2371_s1 + $0xa8] sm:$0xff]  ;;  %1236 = vmatprep.subr.bf16.mxu0 %v1235_v16 }
   0x7   :  { %1266 = vmatpush3.bf16.msra.mxu1 %v1265_v12  ;;  %v1269_v25 = vpack.c.bf16 %v58_v22, %v57_v20  ;;  %v1239_v26 = vpack.c.bf16 %v44_v24, %v43_v23  ;;  %v27_v27 = vld [vmem:[%s2371_s1 + $0x20] sm:$0xff]  ;;  %v28_v28 = vld [vmem:[%s2371_s1 + $0x28] sm:$0xff]  ;;  %v45_v35 = vld [vmem:[%s2371_s1 + $0xb0] sm:$0xff] }
   0x8   :  { %v75_v29 = vld [vmem:[%s2371_s1 + $0x1a0] sm:$0xff]  ;;  %1268 = vmatprep.subr.bf16.mxu1 %v1267_v21  ;;  %v76_v30 = vld [vmem:[%s2371_s1 + $0x1a8] sm:$0xff]  ;;  %v1241_v33 = vpack.c.bf16 %v28_v28, %v27_v27  ;;  %v46_v36 = vld [vmem:[%s2371_s1 + $0xb8] sm:$0xff] }
   0x9   :  { %v59_v31 = vld [vmem:[%s2371_s1 + $0x120] sm:$0xff]  ;;  %v60_v32 = vld [vmem:[%s2371_s1 + $0x128] sm:$0xff]  ;;  %1238 = vmatpush3.bf16.msra.mxu0 %v1237_v17  ;;  %v1271_v34 = vpack.c.bf16 %v76_v30, %v75_v29  ;;  %v29_v37 = vld [vmem:[%s2371_s1 + $0x30] sm:$0xff]  ;;  %v1243_v39 = vpack.c.bf16 %v46_v36, %v45_v35  ;;  %v1694_v17 = vsub.s32 %v293_v2, %v295_v3 }
   0xa   :  { %1240 = vmatprep.subr.bf16.mxu0 %v1239_v26  ;;  %v1273_v38 = vpack.c.bf16 %v60_v32, %v59_v31  ;;  %v30_v40 = vld [vmem:[%s2371_s1 + $0x38] sm:$0xff]  ;;  %v77_v41 = vld [vmem:[%s2371_s1 + $0x1b0] sm:$0xff]  ;;  %v47_v46 = vld [vmem:[%s2371_s1 + $0xc0] sm:$0xff] }
   0xb   :  { %1270 = vmatpush3.bf16.msra.mxu1 %v1269_v25  ;;  %v78_v42 = vld [vmem:[%s2371_s1 + $0x1b8] sm:$0xff]  ;;  %v61_v44 = vld [vmem:[%s2371_s1 + $0x130] sm:$0xff]  ;;  %v48_v47 = vld [vmem:[%s2371_s1 + $0xc8] sm:$0xff]  ;;  %v1245_v48 = vpack.c.bf16 %v30_v40, %v29_v37 }
   0xc   :  { %1272 = vmatprep.subr.bf16.mxu1 %v1271_v34  ;;  %v1275_v43 = vpack.c.bf16 %v78_v42, %v77_v41  ;;  %v62_v45 = vld [vmem:[%s2371_s1 + $0x138] sm:$0xff]  ;;  %v79_v49 = vld [vmem:[%s2371_s1 + $0x1c0] sm:$0xff]  ;;  %v80_v50 = vld [vmem:[%s2371_s1 + $0x1c8] sm:$0xff]  ;;  %v1247_v55 = vpack.c.bf16 %v48_v47, %v47_v46 }
   0xd   :  { %1242 = vmatpush3.bf16.msra.mxu0 %v1241_v33  ;;  %v1277_v54 = vpack.c.bf16 %v62_v45, %v61_v44  ;;  %v31_v56 = vld [vmem:[%s2371_s1 + $0x40] sm:$0xff]  ;;  %v32_v57 = vld [vmem:[%s2371_s1 + $0x48] sm:$0xff]  ;;  %v1279_v59 = vpack.c.bf16 %v80_v50, %v79_v49  ;;  %v49_v61 = vld [vmem:[%s2371_s1 + $0xd0] sm:$0xff] }
   0xe   :  { %1244 = vmatprep.subr.bf16.mxu0 %v1243_v39  ;;  %v63_v58 = vld [vmem:[%s2371_s1 + $0x140] sm:$0xff]  ;;  %v64_v60 = vld [vmem:[%s2371_s1 + $0x148] sm:$0xff]  ;;  %v50_v62 = vld [vmem:[%s2371_s1 + $0xd8] sm:$0xff]  ;;  %v1249_v1 = vpack.c.bf16 %v32_v57, %v31_v56 }
   0xf   :  { %1274 = vmatpush3.bf16.msra.mxu1 %v1273_v38  ;;  %v81_v63 = vld [vmem:[%s2371_s1 + $0x1d0] sm:$0xff]  ;;  %v82_v0 = vld [vmem:[%s2371_s1 + $0x1d8] sm:$0xff]  ;;  %v1281_v4 = vpack.c.bf16 %v64_v60, %v63_v58  ;;  %v1251_v5 = vpack.c.bf16 %v50_v62, %v49_v61  ;;  %v51_v11 = vld [vmem:[%s2371_s1 + $0xe0] sm:$0xff] }
  0x10   :  { %1276 = vmatprep.subr.bf16.mxu1 %v1275_v43  ;;  %v33_v6 = vld [vmem:[%s2371_s1 + $0x50] sm:$0xff]  ;;  %v34_v7 = vld [vmem:[%s2371_s1 + $0x58] sm:$0xff]  ;;  %v1283_v9 = vpack.c.bf16 %v82_v0, %v81_v63  ;;  %v52_v12 = vld [vmem:[%s2371_s1 + $0xe8] sm:$0xff] }
  0x11   :  { %1246 = vmatpush3.bf16.msra.mxu0 %v1245_v48  ;;  %v65_v8 = vld [vmem:[%s2371_s1 + $0x150] sm:$0xff]  ;;  %v66_v10 = vld [vmem:[%s2371_s1 + $0x158] sm:$0xff]  ;;  %v83_v13 = vld [vmem:[%s2371_s1 + $0x1e0] sm:$0xff]  ;;  %v1253_v15 = vpack.c.bf16 %v34_v7, %v33_v6  ;;  %v1255_v19 = vpack.c.bf16 %v52_v12, %v51_v11 }
  0x12   :  { %1248 = vmatprep.subr.bf16.mxu0 %v1247_v55  ;;  %v84_v14 = vld [vmem:[%s2371_s1 + $0x1e8] sm:$0xff]  ;;  %v35_v16 = vld [vmem:[%s2371_s1 + $0x60] sm:$0xff]  ;;  %v1285_v18 = vpack.c.bf16 %v66_v10, %v65_v8  ;;  %v53_v25 = vld [vmem:[%s2371_s1 + $0xf0] sm:$0xff] }
  0x13   :  { %1278 = vmatpush3.bf16.msra.mxu1 %v1277_v54  ;;  %v36_v20 = vld [vmem:[%s2371_s1 + $0x68] sm:$0xff]  ;;  %v67_v21 = vld [vmem:[%s2371_s1 + $0x160] sm:$0xff]  ;;  %v1287_v23 = vpack.c.bf16 %v84_v14, %v83_v13  ;;  %v54_v26 = vld [vmem:[%s2371_s1 + $0xf8] sm:$0xff] }
  0x14   :  { %1280 = vmatprep.subr.bf16.mxu1 %v1279_v59  ;;  %v15_v22 = vld [vmem:[%s2370_s0] sm:$0xff]  ;;  %v68_v24 = vld [vmem:[%s2371_s1 + $0x168] sm:$0xff]  ;;  %v85_v28 = vld [vmem:[%s2371_s1 + $0x1f0] sm:$0xff]  ;;  %v1257_v30 = vpack.c.bf16 %v36_v20, %v35_v16  ;;  %v1259_v34 = vpack.c.bf16 %v54_v26, %v53_v25 }
  0x15   :  { %1250 = vmatpush3.bf16.msra.mxu0 %v1249_v1  ;;  %v19_v27 = vmax.f32 %v15_v22, 0.0  ;;  %v86_v29 = vld [vmem:[%s2371_s1 + $0x1f8] sm:$0xff]  ;;  %v1289_v33 = vpack.c.bf16 %v68_v24, %v67_v21  ;;  %v37_v35 = vld [vmem:[%s2371_s1 + $0x70] sm:$0xff]  ;;  %v103_v41 = vld [vmem:[%s2371_s1 + $0x280] sm:$0xff] }
  0x16   :  { %1252 = vmatprep.subr.bf16.mxu0 %v1251_v5  ;;  %v38_v36 = vld [vmem:[%s2371_s1 + $0x78] sm:$0xff]  ;;  %v69_v37 = vld [vmem:[%s2371_s1 + $0x170] sm:$0xff]  ;;  %v1291_v38 = vpack.c.bf16 %v86_v29, %v85_v28  ;;  %v104_v42 = vld [vmem:[%s2371_s1 + $0x288] sm:$0xff] }
  0x17   :  { %1282 = vmatpush3.bf16.msra.mxu1 %v1281_v4  ;;  %v297_v31 = vrot.slane %v19_v27, %v1694_v17  ;;  %v290_v32 = vcombine.high %v19_v27, %v19_v27  ;;  %v70_v39 = vld [vmem:[%s2371_s1 + $0x178] sm:$0xff]  ;;  %v135_v44 = vld [vmem:[%s2371_s1 + $0x380] sm:$0xff]  ;;  %v136_v45 = vld [vmem:[%s2371_s1 + $0x388] sm:$0xff]  ;;  %v1261_v46 = vpack.c.bf16 %v38_v36, %v37_v35  ;;  %v1295_v49 = vpack.c.bf16 %v104_v42, %v103_v41 }
  0x18   :  { %1284 = vmatprep.subr.bf16.mxu1 %v1283_v9  ;;  %v1293_v48 = vpack.c.bf16 %v70_v39, %v69_v37  ;;  %v87_v50 = vld [vmem:[%s2371_s1 + $0x200] sm:$0xff]  ;;  %v88_v51 = vld [vmem:[%s2371_s1 + $0x208] sm:$0xff]  ;;  %v1327_v53 = vpack.c.bf16 %v136_v45, %v135_v44  ;;  %v105_v55 = vld [vmem:[%s2371_s1 + $0x290] sm:$0xff] }
  0x19   :  { %1254 = vmatpush3.bf16.msra.mxu0 %v1253_v15  ;;  %v305_v40 = vcombine.high %v297_v31, %v297_v31  ;;  %v304_v43 = vrot.slane %v290_v32, %v1694_v17  ;;  %v119_v52 = vld [vmem:[%s2371_s1 + $0x300] sm:$0xff]  ;;  %v120_v54 = vld [vmem:[%s2371_s1 + $0x308] sm:$0xff]  ;;  %v106_v56 = vld [vmem:[%s2371_s1 + $0x298] sm:$0xff]  ;;  %v1297_v59 = vpack.c.bf16 %v88_v51, %v87_v50 }
  0x1a   :  { %1256 = vmatprep.subr.bf16.mxu0 %v1255_v19  ;;  %v137_v57 = vld [vmem:[%s2371_s1 + $0x390] sm:$0xff]  ;;  %v138_v58 = vld [vmem:[%s2371_s1 + $0x398] sm:$0xff]  ;;  %v1329_v60 = vpack.c.bf16 %v120_v54, %v119_v52  ;;  %v1299_v61 = vpack.c.bf16 %v106_v56, %v105_v55  ;;  %v107_v3 = vld [vmem:[%s2371_s1 + $0x2a0] sm:$0xff] }
  0x1b   :  { %1286 = vmatpush3.bf16.msra.mxu1 %v1285_v18  ;;  %438 = vmatprep.mubr.f32.mxu0 %v305_v40  ;;  %v306_v47 = vcombine.high %v304_v43, %v304_v43  ;;  %v89_v62 = vld [vmem:[%s2371_s1 + $0x210] sm:$0xff]  ;;  %v90_v63 = vld [vmem:[%s2371_s1 + $0x218] sm:$0xff]  ;;  %v1331_v1 = vpack.c.bf16 %v138_v58, %v137_v57  ;;  %v108_v4 = vld [vmem:[%s2371_s1 + $0x2a8] sm:$0xff] }
  0x1c   :  { %1288 = vmatprep.subr.bf16.mxu1 %v1287_v23  ;;  %v121_v0 = vld [vmem:[%s2371_s1 + $0x310] sm:$0xff]  ;;  %v122_v2 = vld [vmem:[%s2371_s1 + $0x318] sm:$0xff]  ;;  %v139_v5 = vld [vmem:[%s2371_s1 + $0x3a0] sm:$0xff]  ;;  %v1301_v7 = vpack.c.bf16 %v90_v63, %v89_v62  ;;  %v1303_v9 = vpack.c.bf16 %v108_v4, %v107_v3 }
  0x1d   :  { %1258 = vmatpush3.bf16.msra.mxu0 %v1257_v30  ;;  %508 = vmatprep.mubr.f32.mxu1 %v306_v47  ;;  %v140_v6 = vld [vmem:[%s2371_s1 + $0x3a8] sm:$0xff]  ;;  %v1333_v8 = vpack.c.bf16 %v122_v2, %v121_v0  ;;  %v91_v10 = vld [vmem:[%s2371_s1 + $0x220] sm:$0xff]  ;;  %v109_v15 = vld [vmem:[%s2371_s1 + $0x2b0] sm:$0xff] }
  0x1e   :  { %1260 = vmatprep.subr.bf16.mxu0 %v1259_v34  ;;  %v92_v11 = vld [vmem:[%s2371_s1 + $0x228] sm:$0xff]  ;;  %v123_v12 = vld [vmem:[%s2371_s1 + $0x320] sm:$0xff]  ;;  %v1335_v13 = vpack.c.bf16 %v140_v6, %v139_v5  ;;  %v110_v16 = vld [vmem:[%s2371_s1 + $0x2b8] sm:$0xff] }
  0x1f   :  { %1290 = vmatpush3.bf16.msra.mxu1 %v1289_v33  ;;  %v124_v14 = vld [vmem:[%s2371_s1 + $0x328] sm:$0xff]  ;;  %v141_v18 = vld [vmem:[%s2371_s1 + $0x3b0] sm:$0xff]  ;;  %v142_v19 = vld [vmem:[%s2371_s1 + $0x3b8] sm:$0xff]  ;;  %v1305_v20 = vpack.c.bf16 %v92_v11, %v91_v10  ;;  %v1307_v22 = vpack.c.bf16 %v110_v16, %v109_v15 }
  0x20   :  { %1292 = vmatprep.subr.bf16.mxu1 %v1291_v38  ;;  %v1337_v21 = vpack.c.bf16 %v124_v14, %v123_v12  ;;  %v93_v23 = vld [vmem:[%s2371_s1 + $0x230] sm:$0xff]  ;;  %v94_v24 = vld [vmem:[%s2371_s1 + $0x238] sm:$0xff]  ;;  %v1339_v26 = vpack.c.bf16 %v142_v19, %v141_v18  ;;  %v111_v28 = vld [vmem:[%s2371_s1 + $0x2c0] sm:$0xff] }
  0x21   :  { %1262 = vmatpush3.bf16.msra.mxu0 %v1261_v46  ;;  %v125_v25 = vld [vmem:[%s2371_s1 + $0x330] sm:$0xff]  ;;  %v126_v27 = vld [vmem:[%s2371_s1 + $0x338] sm:$0xff]  ;;  %v112_v29 = vld [vmem:[%s2371_s1 + $0x2c8] sm:$0xff]  ;;  %v1309_v33 = vpack.c.bf16 %v94_v24, %v93_v23 }
  0x22   :  { %1296 = vmatprep.subr.bf16.mxu0 %v1295_v49  ;;  %v143_v30 = vld [vmem:[%s2371_s1 + $0x3c0] sm:$0xff]  ;;  %v16_v32 = vld [vmem:[%s2370_s0 + $0x8] sm:$0xff]  ;;  %v1341_v35 = vpack.c.bf16 %v126_v27, %v125_v25  ;;  %v1311_v36 = vpack.c.bf16 %v112_v29, %v111_v28  ;;  %v113_v42 = vld [vmem:[%s2371_s1 + $0x2d0] sm:$0xff] }
  0x23   :  { %1294 = vmatpush3.bf16.msra.mxu1 %v1293_v48  ;;  %v20_v34 = vmax.f32 %v16_v32, 0.0  ;;  %v95_v37 = vld [vmem:[%s2371_s1 + $0x240] sm:$0xff]  ;;  %v96_v38 = vld [vmem:[%s2371_s1 + $0x248] sm:$0xff]  ;;  %v145_v46 = vld [vmem:[%s2371_s1 + $0x3d0] sm:$0xff] }
  0x24   :  { %1328 = vmatprep.subr.bf16.mxu1 %v1327_v53  ;;  %439 = vmatmul.mubr.f32.vlgmr.msra.gmra.mrb[0].mxu0 %v297_v31  ;;  %v144_v31 = vld [vmem:[%s2371_s1 + $0x3c8] sm:$0xff]  ;;  %v127_v39 = vld [vmem:[%s2371_s1 + $0x340] sm:$0xff]  ;;  %v146_v47 = vld [vmem:[%s2371_s1 + $0x3d8] sm:$0xff]  ;;  %v1313_v48 = vpack.c.bf16 %v96_v38, %v95_v37 }
  0x25   :  { %1298 = vmatpush3.bf16.msra.mxu0 %v1297_v59  ;;  %v1343_v40 = vpack.c.bf16 %v144_v31, %v143_v30  ;;  %v128_v41 = vld [vmem:[%s2371_s1 + $0x348] sm:$0xff]  ;;  %v1864_v44 = vrot.slane %v20_v34, %v1694_v17  ;;  %v307_v45 = vcombine.high %v20_v34, %v20_v34  ;;  %v97_v53 = vld [vmem:[%s2371_s1 + $0x250] sm:$0xff]  ;;  %v98_v54 = vld [vmem:[%s2371_s1 + $0x258] sm:$0xff]  ;;  %v1347_v56 = vpack.c.bf16 %v146_v47, %v145_v46 }
  0x26   :  { %509 = vmatmul.mubr.f32.vlgmr.msra.gmra.mrb[0].mxu1 %v304_v43  ;;  %1300 = vmatprep.subr.bf16.mxu0 %v1299_v61  ;;  %v114_v43 = vld [vmem:[%s2371_s1 + $0x2d8] sm:$0xff]  ;;  %v1345_v51 = vpack.c.bf16 %v128_v41, %v127_v39  ;;  %v129_v55 = vld [vmem:[%s2371_s1 + $0x350] sm:$0xff]  ;;  %v115_v58 = vld [vmem:[%s2371_s1 + $0x2e0] sm:$0xff]  ;;  %v1317_v63 = vpack.c.bf16 %v98_v54, %v97_v53 }
  0x27   :  { %1330 = vmatpush3.bf16.msra.mxu1 %v1329_v60  ;;  %v322_v49 = vcombine.high %v1864_v44, %v1864_v44  ;;  %v1875_v50 = vrot.slane %v307_v45, %v1694_v17  ;;  %v1315_v52 = vpack.c.bf16 %v114_v43, %v113_v42  ;;  %v130_v57 = vld [vmem:[%s2371_s1 + $0x358] sm:$0xff]  ;;  %v116_v59 = vld [vmem:[%s2371_s1 + $0x2e8] sm:$0xff]  ;;  %v147_v61 = vld [vmem:[%s2371_s1 + $0x3e0] sm:$0xff] }
  0x28   :  { %1332 = vmatprep.subr.bf16.mxu1 %v1331_v1  ;;  %v148_v62 = vld [vmem:[%s2371_s1 + $0x3e8] sm:$0xff]  ;;  %v1349_v0 = vpack.c.bf16 %v130_v57, %v129_v55  ;;  %v1319_v1 = vpack.c.bf16 %v116_v59, %v115_v58  ;;  %v99_v2 = vld [vmem:[%s2371_s1 + $0x260] sm:$0xff]  ;;  %v150_v10 = vld [vmem:[%s2371_s1 + $0x3f8] sm:$0xff] }
  0x29   :  { %1302 = vmatpush3.bf16.msra.mxu0 %v1301_v7  ;;  %578 = vmatprep.mubr.f32.mxu0 %v322_v49  ;;  %v323_v60 = vcombine.high %v1875_v50, %v1875_v50  ;;  %v100_v3 = vld [vmem:[%s2371_s1 + $0x268] sm:$0xff]  ;;  %v131_v4 = vld [vmem:[%s2371_s1 + $0x360] sm:$0xff]  ;;  %v1351_v5 = vpack.c.bf16 %v148_v62, %v147_v61  ;;  %v117_v7 = vld [vmem:[%s2371_s1 + $0x2f0] sm:$0xff] }
  0x2a   :  { %1304 = vmatprep.subr.bf16.mxu0 %v1303_v9  ;;  %v132_v6 = vld [vmem:[%s2371_s1 + $0x368] sm:$0xff]  ;;  %v149_v9 = vld [vmem:[%s2371_s1 + $0x3f0] sm:$0xff]  ;;  %v1321_v11 = vpack.c.bf16 %v100_v3, %v99_v2  ;;  %v102_v15 = vld [vmem:[%s2371_s1 + $0x278] sm:$0xff] }
  0x2b   :  { %1334 = vmatpush3.bf16.msra.mxu1 %v1333_v8  ;;  %648 = vmatprep.mubr.f32.mxu1 %v323_v60  ;;  %v118_v8 = vld [vmem:[%s2371_s1 + $0x2f8] sm:$0xff]  ;;  %v1353_v12 = vpack.c.bf16 %v132_v6, %v131_v4  ;;  %v101_v14 = vld [vmem:[%s2371_s1 + $0x270] sm:$0xff]  ;;  %v1355_v18 = vpack.c.bf16 %v150_v10, %v149_v9  ;;  %v200_v23 = vld [vmem:[%s2371_s1 + $0x588] sm:$0xff] }
  0x2c   :  { %1336 = vmatprep.subr.bf16.mxu1 %v1335_v13  ;;  %v1323_v13 = vpack.c.bf16 %v118_v8, %v117_v7  ;;  %v133_v16 = vld [vmem:[%s2371_s1 + $0x370] sm:$0xff]  ;;  %v134_v19 = vld [vmem:[%s2371_s1 + $0x378] sm:$0xff]  ;;  %v1325_v24 = vpack.c.bf16 %v102_v15, %v101_v14  ;;  %v151_v27 = vld [vmem:[%s2371_s1 + $0x400] sm:$0xff] }
  0x2d   :  { %1306 = vmatpush3.bf16.msra.mxu0 %v1305_v20  ;;  %v167_v20 = vld [vmem:[%s2371_s1 + $0x480] sm:$0xff]  ;;  %v1357_v25 = vpack.c.bf16 %v134_v19, %v133_v16  ;;  %v152_v28 = vld [vmem:[%s2371_s1 + $0x408] sm:$0xff]  ;;  %v169_v32 = vld [vmem:[%s2371_s1 + $0x490] sm:$0xff] }
  0x2e   :  { %1308 = vmatprep.subr.bf16.mxu0 %v1307_v22  ;;  %v199_v22 = vld [vmem:[%s2371_s1 + $0x580] sm:$0xff]  ;;  %v184_v31 = vld [vmem:[%s2371_s1 + $0x508] sm:$0xff]  ;;  %v201_v34 = vld [vmem:[%s2371_s1 + $0x590] sm:$0xff] }
  0x2f   :  { %1338 = vmatpush3.bf16.msra.mxu1 %v1337_v21  ;;  %v168_v21 = vld [vmem:[%s2371_s1 + $0x488] sm:$0xff]  ;;  %v183_v29 = vld [vmem:[%s2371_s1 + $0x500] sm:$0xff]  ;;  %v1391_v30 = vpack.c.bf16 %v200_v23, %v199_v22  ;;  %v153_v37 = vld [vmem:[%s2371_s1 + $0x410] sm:$0xff] }
  0x30   :  { %1340 = vmatprep.subr.bf16.mxu1 %v1339_v26  ;;  %v1359_v26 = vpack.c.bf16 %v168_v21, %v167_v20  ;;  %v17_v38 = vld [vmem:[%s2370_s0 + $0x10] sm:$0xff]  ;;  %v1393_v39 = vpack.c.bf16 %v184_v31, %v183_v29  ;;  %v154_v41 = vld [vmem:[%s2371_s1 + $0x418] sm:$0xff]  ;;  %v171_v47 = vld [vmem:[%s2371_s1 + $0x4a0] sm:$0xff] }
  0x31   :  { %1310 = vmatpush3.bf16.msra.mxu0 %v1309_v33  ;;  %v170_v33 = vld [vmem:[%s2371_s1 + $0x498] sm:$0xff]  ;;  %v185_v42 = vld [vmem:[%s2371_s1 + $0x510] sm:$0xff]  ;;  %v21_v45 = vmax.f32 %v17_v38, 0.0  ;;  %v203_v49 = vld [vmem:[%s2371_s1 + $0x5a0] sm:$0xff]  ;;  %v1365_v54 = vpack.c.bf16 %v154_v41, %v153_v37 }
  0x32   :  { %1312 = vmatprep.subr.bf16.mxu0 %v1311_v36  ;;  %v1361_v36 = vpack.c.bf16 %v152_v28, %v151_v27  ;;  %v186_v43 = vld [vmem:[%s2371_s1 + $0x518] sm:$0xff]  ;;  %v156_v57 = vld [vmem:[%s2371_s1 + $0x428] sm:$0xff]  ;;  %v187_v58 = vld [vmem:[%s2371_s1 + $0x520] sm:$0xff] }
  0x33   :  { %1342 = vmatpush3.bf16.msra.mxu1 %v1341_v35  ;;  %v202_v35 = vld [vmem:[%s2371_s1 + $0x598] sm:$0xff]  ;;  %v324_v53 = vcombine.high %v21_v45, %v21_v45  ;;  %v1397_v55 = vpack.c.bf16 %v186_v43, %v185_v42  ;;  %v188_v61 = vld [vmem:[%s2371_s1 + $0x528] sm:$0xff]  ;;  %v173_v62 = vld [vmem:[%s2371_s1 + $0x4b0] sm:$0xff] }
  0x34   :  { %1344 = vmatprep.subr.bf16.mxu1 %v1343_v40  ;;  %v1363_v40 = vpack.c.bf16 %v170_v33, %v169_v32  ;;  %v1395_v46 = vpack.c.bf16 %v202_v35, %v201_v34  ;;  %v1401_v4 = vpack.c.bf16 %v188_v61, %v187_v58  ;;  %v157_v6 = vld [vmem:[%s2371_s1 + $0x430] sm:$0xff]  ;;  %v158_v7 = vld [vmem:[%s2371_s1 + $0x438] sm:$0xff]  ;;  %v208_v14 = vld [vmem:[%s2371_s1 + $0x5c8] sm:$0xff] }
  0x35   :  { %1314 = vmatpush3.bf16.msra.mxu0 %v1313_v48  ;;  %v172_v48 = vld [vmem:[%s2371_s1 + $0x4a8] sm:$0xff]  ;;  %v2019_v59 = vrot.slane %v324_v53, %v1694_v17  ;;  %v189_v8 = vld [vmem:[%s2371_s1 + $0x530] sm:$0xff]  ;;  %v190_v10 = vld [vmem:[%s2371_s1 + $0x538] sm:$0xff]  ;;  %v1373_v15 = vpack.c.bf16 %v158_v7, %v157_v6 }
  0x36   :  { %1316 = vmatprep.subr.bf16.mxu0 %v1315_v52  ;;  %v2004_v52 = vrot.slane %v21_v45, %v1694_v17  ;;  %v1405_v16 = vpack.c.bf16 %v190_v10, %v189_v8  ;;  %v159_v19 = vld [vmem:[%s2371_s1 + $0x440] sm:$0xff]  ;;  %v160_v20 = vld [vmem:[%s2371_s1 + $0x448] sm:$0xff]  ;;  %v210_v27 = vld [vmem:[%s2371_s1 + $0x5d8] sm:$0xff] }
  0x37   :  { %1346 = vmatpush3.bf16.msra.mxu1 %v1345_v51  ;;  %v204_v51 = vld [vmem:[%s2371_s1 + $0x5a8] sm:$0xff]  ;;  %v340_v2 = vcombine.high %v2019_v59, %v2019_v59  ;;  %v191_v21 = vld [vmem:[%s2371_s1 + $0x540] sm:$0xff]  ;;  %v1377_v28 = vpack.c.bf16 %v160_v20, %v159_v19  ;;  %v161_v31 = vld [vmem:[%s2371_s1 + $0x450] sm:$0xff] }
  0x38   :  { %1348 = vmatprep.subr.bf16.mxu1 %v1347_v56  ;;  %v155_v56 = vld [vmem:[%s2371_s1 + $0x420] sm:$0xff]  ;;  %v1399_v60 = vpack.c.bf16 %v204_v51, %v203_v49  ;;  %v192_v23 = vld [vmem:[%s2371_s1 + $0x548] sm:$0xff]  ;;  %v162_v32 = vld [vmem:[%s2371_s1 + $0x458] sm:$0xff] }
  0x39   :  { %1318 = vmatpush3.bf16.msra.mxu0 %v1317_v63  ;;  %v174_v63 = vld [vmem:[%s2371_s1 + $0x4b8] sm:$0xff]  ;;  %v1369_v3 = vpack.c.bf16 %v156_v57, %v155_v56  ;;  %v1409_v29 = vpack.c.bf16 %v192_v23, %v191_v21  ;;  %v193_v33 = vld [vmem:[%s2371_s1 + $0x550] sm:$0xff]  ;;  %v180_v37 = vld [vmem:[%s2371_s1 + $0x4e8] sm:$0xff] }
  0x3a   :  { %1320 = vmatprep.subr.bf16.mxu0 %v1319_v1  ;;  %v206_v1 = vld [vmem:[%s2371_s1 + $0x5b8] sm:$0xff]  ;;  %v211_v38 = vld [vmem:[%s2371_s1 + $0x5e0] sm:$0xff]  ;;  %v164_v42 = vld [vmem:[%s2371_s1 + $0x468] sm:$0xff] }
  0x3b   :  { %1350 = vmatpush3.bf16.msra.mxu1 %v1349_v0  ;;  %v205_v0 = vld [vmem:[%s2371_s1 + $0x5b0] sm:$0xff]  ;;  %v194_v35 = vld [vmem:[%s2371_s1 + $0x558] sm:$0xff]  ;;  %v163_v41 = vld [vmem:[%s2371_s1 + $0x460] sm:$0xff] }
  0x3c   :  { %1352 = vmatprep.subr.bf16.mxu1 %v1351_v5  ;;  %v1371_v5 = vpack.c.bf16 %v174_v63, %v173_v62  ;;  %v1403_v9 = vpack.c.bf16 %v206_v1, %v205_v0  ;;  %v1413_v43 = vpack.c.bf16 %v194_v35, %v193_v33  ;;  %v182_v51 = vld [vmem:[%s2371_s1 + $0x4f8] sm:$0xff] }
  0x3d   :  { %1322 = vmatpush3.bf16.msra.mxu0 %v1321_v11  ;;  %v175_v11 = vld [vmem:[%s2371_s1 + $0x4c0] sm:$0xff]  ;;  %v18_v53 = vld [vmem:[%s2370_s0 + $0x18] sm:$0xff] }
  0x3e   :  { %1324 = vmatprep.subr.bf16.mxu0 %v1323_v13  ;;  %v207_v13 = vld [vmem:[%s2371_s1 + $0x5c0] sm:$0xff] }
  0x3f   :  { %1354 = vmatpush3.bf16.msra.mxu1 %v1353_v12  ;;  %v176_v12 = vld [vmem:[%s2371_s1 + $0x4c8] sm:$0xff]  ;;  %v1407_v22 = vpack.c.bf16 %v208_v14, %v207_v13 }
  0x40   :  { %1356 = vmatprep.subr.bf16.mxu1 %v1355_v18  ;;  %v1375_v18 = vpack.c.bf16 %v176_v12, %v175_v11 }
  0x41   :  { %1326 = vmatpush3.bf16.msra.mxu0 %v1325_v24  ;;  %v177_v24 = vld [vmem:[%s2371_s1 + $0x4d0] sm:$0xff] }
  0x42   :  { %1360 = vmatprep.subr.bf16.mxu0 %v1359_v26  ;;  %v209_v26 = vld [vmem:[%s2371_s1 + $0x5d0] sm:$0xff] }
  0x43   :  { %1358 = vmatpush3.bf16.msra.mxu1 %v1357_v25  ;;  %v178_v25 = vld [vmem:[%s2371_s1 + $0x4d8] sm:$0xff]  ;;  %v1411_v34 = vpack.c.bf16 %v210_v27, %v209_v26 }
  0x44   :  { %1392 = vmatprep.subr.bf16.mxu1 %v1391_v30  ;;  %579 = vmatmul.mubr.f32.vlgmr.msra.gmra.mrb[2].mxu0 %v1864_v44  ;;  %v1367_v44 = vpack.c.bf16 %v172_v48, %v171_v47  ;;  %v1379_v30 = vpack.c.bf16 %v178_v25, %v177_v24  ;;  %v196_v47 = vld [vmem:[%s2371_s1 + $0x568] sm:$0xff]  ;;  %v181_v48 = vld [vmem:[%s2371_s1 + $0x4f0] sm:$0xff] }
  0x45   :  { %1362 = vmatpush3.bf16.msra.mxu0 %v1361_v36  ;;  %v179_v36 = vld [vmem:[%s2371_s1 + $0x4e0] sm:$0xff] }
  0x46   :  { %649 = vmatmul.mubr.f32.vlgmr.msra.gmra.mrb[2].mxu1 %v1875_v50  ;;  %1364 = vmatprep.subr.bf16.mxu0 %v1363_v40  ;;  %v339_v50 = vcombine.high %v2004_v52, %v2004_v52  ;;  %v1381_v40 = vpack.c.bf16 %v162_v32, %v161_v31  ;;  %v1383_v45 = vpack.c.bf16 %v180_v37, %v179_v36 }
  0x47   :  { %1394 = vmatpush3.bf16.msra.mxu1 %v1393_v39  ;;  %788 = vmatprep.mubr.f32.mxu1 %v340_v2  ;;  %v212_v39 = vld [vmem:[%s2371_s1 + $0x5e8] sm:$0xff] }
  0x48   :  { %1396 = vmatprep.subr.bf16.mxu1 %v1395_v46  ;;  %718 = vmatprep.mubr.f32.mxu0 %v339_v50  ;;  %v195_v46 = vld [vmem:[%s2371_s1 + $0x560] sm:$0xff]  ;;  %v1415_v49 = vpack.c.bf16 %v212_v39, %v211_v38 }
  0x49   :  { %1366 = vmatpush3.bf16.msra.mxu0 %v1365_v54 }
  0x4a   :  { %1368 = vmatprep.subr.bf16.mxu0 %v1367_v44 }
  0x4b   :  { %1398 = vmatpush3.bf16.msra.mxu1 %v1397_v55 }
  0x4c   :  { %1400 = vmatprep.subr.bf16.mxu1 %v1399_v60 }
  0x4d   :  { %1370 = vmatpush3.bf16.msra.mxu0 %v1369_v3 }
  0x4e   :  { %1372 = vmatprep.subr.bf16.mxu0 %v1371_v5 }
  0x4f   :  { %1402 = vmatpush3.bf16.msra.mxu1 %v1401_v4 }
  0x50   :  { %1404 = vmatprep.subr.bf16.mxu1 %v1403_v9 }
  0x51   :  { %1374 = vmatpush3.bf16.msra.mxu0 %v1373_v15 }
  0x52   :  { %1376 = vmatprep.subr.bf16.mxu0 %v1375_v18 }
  0x53   :  { %1406 = vmatpush3.bf16.msra.mxu1 %v1405_v16 }
  0x54   :  { %1408 = vmatprep.subr.bf16.mxu1 %v1407_v22 }
  0x55   :  { %1378 = vmatpush3.bf16.msra.mxu0 %v1377_v28 }
  0x56   :  { %1380 = vmatprep.subr.bf16.mxu0 %v1379_v30 }
  0x57   :  { %1410 = vmatpush3.bf16.msra.mxu1 %v1409_v29 }
  0x58   :  { %1412 = vmatprep.subr.bf16.mxu1 %v1411_v34 }
  0x59   :  { %8 = vsyncpa [#allocation3], 0  ;;  %v213_v54 = vld [vmem:[%s2371_s1 + $0x5f0] sm:$0xff]  ;;  %v214_v55 = vld [vmem:[%s2371_s1 + $0x5f8] sm:$0xff]  ;;  %v22_v44 = vmax.f32 %v18_v53, 0.0  ;;  %1382 = vmatpush3.bf16.msra.mxu0 %v1381_v40  ;;  %v1385_v56 = vpack.c.bf16 %v164_v42, %v163_v41  ;;  %v1417_v57 = vpack.c.bf16 %v196_v47, %v195_v46  ;;  %v1387_v58 = vpack.c.bf16 %v182_v51, %v181_v48 }
  0x5a   :  { %1384 = vmatprep.subr.bf16.mxu0 %v1383_v45  ;;  %v165_v50 = vld [vmem:[%s2371_s1 + $0x470] sm:$0xff]  ;;  %v166_v60 = vld [vmem:[%s2371_s1 + $0x478] sm:$0xff]  ;;  %v1419_v62 = vpack.c.bf16 %v214_v55, %v213_v54  ;;  %v231_v0 = vld [vmem:[%s2371_s1 + $0x680] sm:$0xff]  ;;  %vm934_vm0 = vcmask 74752  }
  0x5b   :  { %1414 = vmatpush3.bf16.msra.mxu1 %v1413_v43  ;;  %v197_v61 = vld [vmem:[%s2371_s1 + $0x570] sm:$0xff]  ;;  %v198_v63 = vld [vmem:[%s2371_s1 + $0x578] sm:$0xff]  ;;  %v232_v1 = vld [vmem:[%s2371_s1 + $0x688] sm:$0xff]  ;;  %v341_v4 = vcombine.high %v22_v44, %v22_v44  ;;  %v1389_v5 = vpack.c.bf16 %v166_v60, %v165_v50  ;;  %v2180_v15 = vrot.slane %v22_v44, %v1694_v17 }
  0x5c   :  { %1416 = vmatprep.subr.bf16.mxu1 %v1415_v49  ;;  %v263_v2 = vld [vmem:[%s2371_s1 + $0x780] sm:$0xff]  ;;  %v264_v3 = vld [vmem:[%s2371_s1 + $0x788] sm:$0xff]  ;;  %v1421_v6 = vpack.c.bf16 %v198_v63, %v197_v61  ;;  %v1423_v7 = vpack.c.bf16 %v232_v1, %v231_v0  ;;  %v233_v13 = vld [vmem:[%s2371_s1 + $0x690] sm:$0xff] }
  0x5d   :  { %1386 = vmatpush3.bf16.msra.mxu0 %v1385_v56  ;;  %v215_v8 = vld [vmem:[%s2371_s1 + $0x600] sm:$0xff]  ;;  %v216_v9 = vld [vmem:[%s2371_s1 + $0x608] sm:$0xff]  ;;  %v1455_v11 = vpack.c.bf16 %v264_v3, %v263_v2  ;;  %v234_v14 = vld [vmem:[%s2371_s1 + $0x698] sm:$0xff]  ;;  %v2189_v19 = vrot.slane %v341_v4, %v1694_v17  ;;  %v356_v29 = vcombine.high %v2180_v15, %v2180_v15 }
  0x5e   :  { %1388 = vmatprep.subr.bf16.mxu0 %v1387_v58  ;;  %v247_v10 = vld [vmem:[%s2371_s1 + $0x700] sm:$0xff]  ;;  %v248_v12 = vld [vmem:[%s2371_s1 + $0x708] sm:$0xff]  ;;  %v265_v16 = vld [vmem:[%s2371_s1 + $0x790] sm:$0xff]  ;;  %v1425_v20 = vpack.c.bf16 %v216_v9, %v215_v8  ;;  %v1427_v22 = vpack.c.bf16 %v234_v14, %v233_v13 }
  0x5f   :  { %1418 = vmatpush3.bf16.msra.mxu1 %v1417_v57  ;;  %v266_v18 = vld [vmem:[%s2371_s1 + $0x798] sm:$0xff]  ;;  %v1457_v21 = vpack.c.bf16 %v248_v12, %v247_v10  ;;  %v217_v23 = vld [vmem:[%s2371_s1 + $0x610] sm:$0xff]  ;;  %v235_v27 = vld [vmem:[%s2371_s1 + $0x6a0] sm:$0xff]  ;;  %v357_v32 = vcombine.high %v2189_v19, %v2189_v19 }
  0x60   :  { %1420 = vmatprep.subr.bf16.mxu1 %v1419_v62  ;;  %v218_v24 = vld [vmem:[%s2371_s1 + $0x618] sm:$0xff]  ;;  %v249_v25 = vld [vmem:[%s2371_s1 + $0x710] sm:$0xff]  ;;  %v1459_v17 = vpack.c.bf16 %v266_v18, %v265_v16  ;;  %v236_v28 = vld [vmem:[%s2371_s1 + $0x6a8] sm:$0xff] }
  0x61   :  { %1390 = vmatpush3.bf16.msra.mxu0 %v1389_v5  ;;  %v250_v26 = vld [vmem:[%s2371_s1 + $0x718] sm:$0xff]  ;;  %v267_v30 = vld [vmem:[%s2371_s1 + $0x7a0] sm:$0xff]  ;;  %v268_v31 = vld [vmem:[%s2371_s1 + $0x7a8] sm:$0xff]  ;;  %v1429_v33 = vpack.c.bf16 %v218_v24, %v217_v23  ;;  %v1431_v35 = vpack.c.bf16 %v236_v28, %v235_v27 }
  0x62   :  { %1424 = vmatprep.subr.bf16.mxu0 %v1423_v7  ;;  %v1461_v34 = vpack.c.bf16 %v250_v26, %v249_v25  ;;  %v220_v36 = vld [vmem:[%s2371_s1 + $0x628] sm:$0xff]  ;;  %v251_v37 = vld [vmem:[%s2371_s1 + $0x720] sm:$0xff]  ;;  %v1463_v38 = vpack.c.bf16 %v268_v31, %v267_v30  ;;  %v237_v39 = vld [vmem:[%s2371_s1 + $0x6b0] sm:$0xff] }
  0x63   :  { %1422 = vmatpush3.bf16.msra.mxu1 %v1421_v6  ;;  %v238_v40 = vld [vmem:[%s2371_s1 + $0x6b8] sm:$0xff]  ;;  %v269_v41 = vld [vmem:[%s2371_s1 + $0x7b0] sm:$0xff]  ;;  %v239_v54 = vld [vmem:[%s2371_s1 + $0x6c0] sm:$0xff] }
  0x64   :  { %1456 = vmatprep.subr.bf16.mxu1 %v1455_v11  ;;  %719 = vmatmul.mubr.f32.vlgmr.msra.gmra.mrb[4].mxu0 %v2004_v52  ;;  %v219_v52 = vld [vmem:[%s2371_s1 + $0x620] sm:$0xff]  ;;  %v270_v42 = vld [vmem:[%s2371_s1 + $0x7b8] sm:$0xff]  ;;  %v1435_v46 = vpack.c.bf16 %v238_v40, %v237_v39  ;;  %v221_v47 = vld [vmem:[%s2371_s1 + $0x630] sm:$0xff] }
  0x65   :  { %1426 = vmatpush3.bf16.msra.mxu0 %v1425_v20  ;;  %858 = vmatprep.mubr.f32.mxu0 %v356_v29  ;;  %v1433_v43 = vpack.c.bf16 %v220_v36, %v219_v52  ;;  %v222_v48 = vld [vmem:[%s2371_s1 + $0x638] sm:$0xff]  ;;  %v253_v49 = vld [vmem:[%s2371_s1 + $0x730] sm:$0xff]  ;;  %v1467_v51 = vpack.c.bf16 %v270_v42, %v269_v41  ;;  %v240_v55 = vld [vmem:[%s2371_s1 + $0x6c8] sm:$0xff] }
  0x66   :  { %789 = vmatmul.mubr.f32.vlgmr.msra.gmra.mrb[4].mxu1 %v2019_v59  ;;  %1428 = vmatprep.subr.bf16.mxu0 %v1427_v22  ;;  %v252_v59 = vld [vmem:[%s2371_s1 + $0x728] sm:$0xff]  ;;  %v254_v53 = vld [vmem:[%s2371_s1 + $0x738] sm:$0xff]  ;;  %v271_v44 = vld [vmem:[%s2371_s1 + $0x7c0] sm:$0xff]  ;;  %v1437_v57 = vpack.c.bf16 %v222_v48, %v221_v47  ;;  %v1439_v50 = vpack.c.bf16 %v240_v55, %v239_v54 }
  0x67   :  { %1458 = vmatpush3.bf16.msra.mxu1 %v1457_v21  ;;  %928 = vmatprep.mubr.f32.mxu1 %v357_v32  ;;  %v1465_v45 = vpack.c.bf16 %v252_v59, %v251_v37  ;;  %v272_v56 = vld [vmem:[%s2371_s1 + $0x7c8] sm:$0xff]  ;;  %v1469_v58 = vpack.c.bf16 %v254_v53, %v253_v49  ;;  %v223_v60 = vld [vmem:[%s2371_s1 + $0x640] sm:$0xff]  ;;  %v241_v1 = vld [vmem:[%s2371_s1 + $0x6d0] sm:$0xff] }
  0x68   :  { %1460 = vmatprep.subr.bf16.mxu1 %v1459_v17  ;;  %v224_v61 = vld [vmem:[%s2371_s1 + $0x648] sm:$0xff]  ;;  %v255_v62 = vld [vmem:[%s2371_s1 + $0x740] sm:$0xff]  ;;  %v1471_v63 = vpack.c.bf16 %v272_v56, %v271_v44  ;;  %v242_v2 = vld [vmem:[%s2371_s1 + $0x6d8] sm:$0xff] }
  0x69   :  { %1430 = vmatpush3.bf16.msra.mxu0 %v1429_v33  ;;  %v256_v0 = vld [vmem:[%s2371_s1 + $0x748] sm:$0xff]  ;;  %v273_v3 = vld [vmem:[%s2371_s1 + $0x7d0] sm:$0xff]  ;;  %v274_v4 = vld [vmem:[%s2371_s1 + $0x7d8] sm:$0xff]  ;;  %v1441_v5 = vpack.c.bf16 %v224_v61, %v223_v60  ;;  %v1443_v7 = vpack.c.bf16 %v242_v2, %v241_v1 }
  0x6a   :  { %1432 = vmatprep.subr.bf16.mxu0 %v1431_v35  ;;  %v1473_v6 = vpack.c.bf16 %v256_v0, %v255_v62  ;;  %v225_v8 = vld [vmem:[%s2371_s1 + $0x650] sm:$0xff]  ;;  %v226_v9 = vld [vmem:[%s2371_s1 + $0x658] sm:$0xff]  ;;  %v1475_v11 = vpack.c.bf16 %v274_v4, %v273_v3  ;;  %v243_v13 = vld [vmem:[%s2371_s1 + $0x6e0] sm:$0xff] }
  0x6b   :  { %1462 = vmatpush3.bf16.msra.mxu1 %v1461_v34  ;;  %v257_v10 = vld [vmem:[%s2371_s1 + $0x750] sm:$0xff]  ;;  %v258_v12 = vld [vmem:[%s2371_s1 + $0x758] sm:$0xff]  ;;  %v244_v14 = vld [vmem:[%s2371_s1 + $0x6e8] sm:$0xff]  ;;  %v1445_v20 = vpack.c.bf16 %v226_v9, %v225_v8 }
  0x6c   :  { %1464 = vmatprep.subr.bf16.mxu1 %v1463_v38  ;;  %v275_v16 = vld [vmem:[%s2371_s1 + $0x7e0] sm:$0xff]  ;;  %v276_v18 = vld [vmem:[%s2371_s1 + $0x7e8] sm:$0xff]  ;;  %v1477_v21 = vpack.c.bf16 %v258_v12, %v257_v10  ;;  %v1447_v22 = vpack.c.bf16 %v244_v14, %v243_v13  ;;  %v245_v27 = vld [vmem:[%s2371_s1 + $0x6f0] sm:$0xff] }
  0x6d   :  { %1434 = vmatpush3.bf16.msra.mxu0 %v1433_v43  ;;  %v227_v23 = vld [vmem:[%s2371_s1 + $0x660] sm:$0xff]  ;;  %v228_v24 = vld [vmem:[%s2371_s1 + $0x668] sm:$0xff]  ;;  %v1479_v17 = vpack.c.bf16 %v276_v18, %v275_v16  ;;  %v246_v28 = vld [vmem:[%s2371_s1 + $0x6f8] sm:$0xff] }
  0x6e   :  { %1436 = vmatprep.subr.bf16.mxu0 %v1435_v46  ;;  %v259_v25 = vld [vmem:[%s2371_s1 + $0x760] sm:$0xff]  ;;  %v260_v26 = vld [vmem:[%s2371_s1 + $0x768] sm:$0xff]  ;;  %v277_v29 = vld [vmem:[%s2371_s1 + $0x7f0] sm:$0xff]  ;;  %v1449_v31 = vpack.c.bf16 %v228_v24, %v227_v23  ;;  %v1451_v33 = vpack.c.bf16 %v246_v28, %v245_v27 }
  0x6f   :  { %1466 = vmatpush3.bf16.msra.mxu1 %v1465_v45  ;;  %v278_v30 = vld [vmem:[%s2371_s1 + $0x7f8] sm:$0xff]  ;;  %v1481_v32 = vpack.c.bf16 %v260_v26, %v259_v25  ;;  %v229_v34 = vld [vmem:[%s2371_s1 + $0x670] sm:$0xff]  ;;  %v950_v40 = vld [vmem:[%s2372_s2] ss:$0 sm:$0xff] }
  0x70   :  { %1468 = vmatprep.subr.bf16.mxu1 %v1467_v51  ;;  %v230_v35 = vld [vmem:[%s2371_s1 + $0x678] sm:$0xff]  ;;  %v1483_v52 = vpack.c.bf16 %v278_v30, %v277_v29  ;;  %v261_v36 = vld [vmem:[%s2371_s1 + $0x770] sm:$0xff] }
  0x71   :  { %1438 = vmatpush3.bf16.msra.mxu0 %v1437_v57  ;;  %v262_v37 = vld [vmem:[%s2371_s1 + $0x778] sm:$0xff]  ;;  %v1453_v38 = vpack.c.bf16 %v230_v35, %v229_v34  ;;  %s1514_s1 = smov [#allocation2]  }
  0x72   :  { %1440 = vmatprep.subr.bf16.mxu0 %v1439_v50  ;;  %v1485_v59 = vpack.c.bf16 %v262_v37, %v261_v36  ;;  %s942_s2 = sshll.u32 %s1514_s1, 4  ;;  %s943_s2 = int_to_ptr.vmem [resolvable:$true] %s942_s2 }
  0x73   :  { %1470 = vmatpush3.bf16.msra.mxu1 %v1469_v58  ;;  %s1489_s16 = scalar_lea.vmem %s943_s2, 32  ;;  %p1494_p1 = scmp.lt.s32.totalorder %s943_s2, %s943_s2 }
  0x74   :  { %1472 = vmatprep.subr.bf16.mxu1 %v1471_v63  ;;  %p1490_p0 = scmp.ne.s32.totalorder %s943_s2, %s1489_s16  ;;  %p1495_p2 = scmp.lt.s32.totalorder %s1489_s16, %s1489_s16 }
  0x75   :  { %1442 = vmatpush3.bf16.msra.mxu0 %v1441_v5 }
  0x76   :  { %1444 = vmatprep.subr.bf16.mxu0 %v1443_v7  ;;  %p1496_p3 = por %p1495_p2, %p1494_p1 }
  0x77   :  { %1474 = vmatpush3.bf16.msra.mxu1 %v1473_v6 }
  0x78   :  { %1476 = vmatprep.subr.bf16.mxu1 %v1475_v11  ;;  %p1497_p4 = pnand %p1496_p3, %p1490_p0 }
  0x79   :  { %1446 = vmatpush3.bf16.msra.mxu0 %v1445_v20 }
  0x7a   :  { %1448 = vmatprep.subr.bf16.mxu0 %v1447_v22 }
  0x7b   :  { %1478 = vmatpush3.bf16.msra.mxu1 %v1477_v21 }
  0x7c   :  { %1480 = vmatprep.subr.bf16.mxu1 %v1479_v17 }
  0x7d   :  { %1450 = vmatpush3.bf16.msra.mxu0 %v1449_v31 }
  0x7e   :  { %1452 = vmatprep.subr.bf16.mxu0 %v1451_v33 }
  0x7f   :  { %1482 = vmatpush3.bf16.msra.mxu1 %v1481_v32 }
  0x80   :  { %1484 = vmatprep.subr.bf16.mxu1 %v1483_v52 }
  0x81   :  { %1454 = vmatpush3.bf16.msra.mxu0 %v1453_v38 }
  0x83   :  { %1486 = vmatpush3.bf16.msra.mxu1 %v1485_v59 }
  0x84   :  { %859 = vmatmul.mubr.f32.vlgmr.msra.gmra.mrb[6].mxu0 %v2180_v15 }
  0x86   :  { %929 = vmatmul.mubr.f32.vlgmr.msra.gmra.mrb[6].mxu1 %v2189_v19 }
  0xf7   :  { %v983_v39 = vpop.f32.mrb[0].mxu0 }
  0xf8   :  { %v984_v41 = vpop.f32.mrb[1].mxu0 }
  0xf9   :  { %v1018_v42 = vpop.f32.mrb[0].mxu1  ;;  %v985_v43 = vadd.f32 %v984_v41, %v983_v39 }
  0xfa   :  { %v1019_v45 = vpop.f32.mrb[1].mxu1 }
  0xfb   :  { %v1020_v46 = vadd.f32 %v1019_v45, %v1018_v42  ;;  %v441_v47 = vadd.f32 %v985_v43, %v950_v40 }
  0xfd   :  { %v511_v48 = vadd.f32 %v1020_v46, %v441_v47 }
 0x117   :  { %v1053_v49 = vpop.f32.mrb[2].mxu0 }
 0x118   :  { %v1054_v51 = vpop.f32.mrb[3].mxu0 }
 0x119   :  { %v1088_v53 = vpop.f32.mrb[2].mxu1  ;;  %v1055_v54 = vadd.f32 %v1054_v51, %v1053_v49 }
 0x11a   :  { %v1089_v55 = vpop.f32.mrb[3].mxu1 }
 0x11b   :  { %v1090_v15 = vadd.f32 %v1089_v55, %v1088_v53  ;;  %v581_v44 = vadd.f32 %v1055_v54, %v511_v48 }
 0x11d   :  { %v651_v19 = vadd.f32 %v1090_v15, %v581_v44 }
 0x137   :  { %v1123_v56 = vpop.f32.mrb[4].mxu0 }
 0x138   :  { %v1124_v57 = vpop.f32.mrb[5].mxu0 }
 0x139   :  { %v1158_v58 = vpop.f32.mrb[4].mxu1  ;;  %v1125_v50 = vadd.f32 %v1124_v57, %v1123_v56 }
 0x13a   :  { %v1159_v60 = vpop.f32.mrb[5].mxu1 }
 0x13b   :  { %v1160_v61 = vadd.f32 %v1159_v60, %v1158_v58  ;;  %v721_v62 = vadd.f32 %v1125_v50, %v651_v19 }
 0x13d   :  { %v791_v63 = vadd.f32 %v1160_v61, %v721_v62 }
 0x157   :  { %v1193_v0 = vpop.f32.mrb[6].mxu0 }
 0x158   :  { %v1194_v1 = vpop.f32.mrb[7].mxu0 }
 0x159   :  { %v1228_v2 = vpop.f32.mrb[6].mxu1  ;;  %v1195_v3 = vadd.f32 %v1194_v1, %v1193_v0 }
 0x15a   :  { %v1229_v4 = vpop.f32.mrb[7].mxu1 }
 0x15b   :  { %v1230_v5 = vadd.f32 %v1229_v4, %v1228_v2  ;;  %v861_v6 = vadd.f32 %v1195_v3, %v791_v63 }
 0x15d   :  { %v931_v7 = vadd.f32 %v1230_v5, %v861_v6 }
 0x15f   :  { %935 = vst.msk [vmem:[#allocation2] sm:$0x3] %vm934_vm0, %v931_v7 }
 0x160   :  { %1500 = shalt.err (!%p1497_p4)
}
 0x161   :  { %s1501_s19 = scalar_lea.hbm %s2373_s3, 32 }
 0x162   :  { %p1502_p5 = scmp.ne.s32.totalorder %s2373_s3, %s1501_s19  ;;  %p1505_p6 = scmp.lt.u32.totalorder %s1501_s19, %s2373_s3 }
 0x164   :  { %p1507_p7 = pnand %p1505_p6, %p1502_p5 }
 0x166   :  { %1510 = shalt.err (!%p1507_p7)
}
 0x167   :  { %945 = dma.vmem_to_hbm [thread:$0]  %s943_s2, 32, %s2373_s3, [#allocation3]  }
 0x168   :  { %1511 = dma.done.wait [#allocation3], 32  }
 0x169   :  { %1512 = vsyncadd [#allocation3], 4294967264 }
 0x16a   :  { %949 = vsyncpa [#allocation3], 1 }

</bundles_post_ra>
